<compile_context>
chip_gen: v5e
topology: v5e:2x2
jax: 0.10.0
libtpu: 0.0.40
codegen_flags: <defaults>
</compile_context>

<pallas_src>
import math

import jax
import jax.numpy as jnp
from jax.experimental import pallas as pl
from jax.experimental.pallas import tpu as pltpu


# ----------------------------- static config --------------------------------
B = 2          # batch
S = 8          # sequence length
D = 32         # model dimension
H = 8          # attention heads
DH = D // H    # head dim
G = B * H      # (batch, head) groups -> einsum batch
BS = B * S     # flattened token count
LANE = 128     # vreg lane width (lane-dense output padding)
LN_EPS = 1e-5


def _layer_norm(v):
    mu = jnp.mean(v, axis=-1, keepdims=True)
    c = v - mu
    var = jnp.mean(c * c, axis=-1, keepdims=True)
    return c * jax.lax.rsqrt(var + LN_EPS)


# ----------------------------- kernel ----------------------------------------
def transformer_kernel(x_ref, ln1w_ref, ln1b_ref, wqkv_ref, bqkv_ref,
                       wo_ref, ob_ref, linw_ref, linb_ref, o_ref):
    x = x_ref[...]                                           # (BS, D) f32

    # ---- attention_norm: affine LayerNorm (pre-norm) ----
    y = _layer_norm(x) * ln1w_ref[...] + ln1b_ref[...]       # (BS, D)

    # ---- replicate each batch's rows once per head: (G, S, D) ----
    # Tile-aligned row slices + stack along the leading axis (no transposes,
    # no lane shuffles).
    y_rows = [y[b * S:(b + 1) * S, :] for b in range(B)]
    y_g = jnp.stack([y_rows[b] for b in range(B) for _ in range(H)], axis=0)

    # ---- fused, pre-scaled, head-major QKV projection: one batched matmul ----
    qkv_g = jnp.einsum("gsd,gde->gse", y_g, wqkv_ref[...],
                       preferred_element_type=jnp.float32) + bqkv_ref[...]
    q_g = qkv_g[:, :, 0 * DH:1 * DH]     # 1/sqrt(DH) already folded into q
    k_g = qkv_g[:, :, 1 * DH:2 * DH]
    v_g = qkv_g[:, :, 2 * DH:3 * DH]

    # ---- scaled dot-product attention for all (batch, head) groups at once ----
    s = jnp.einsum("gsd,gtd->gst", q_g, k_g,
                   preferred_element_type=jnp.float32)       # (G, S, S)
    s = s - jnp.max(s, axis=-1, keepdims=True)
    p = jnp.exp(s)
    p = p * pl.reciprocal(jnp.sum(p, axis=-1, keepdims=True), approx=True)
    o_g = jnp.einsum("gst,gtd->gsd", p, v_g,
                     preferred_element_type=jnp.float32)     # (G, S, DH)

    # ---- output projection per head, then reduce over heads (no lane concat) ----
    proj_g = jnp.einsum("gsd,gde->gse", o_g, wo_ref[...],
                        preferred_element_type=jnp.float32)  # (G, S, D)
    attn = jnp.concatenate(
        [jnp.sum(proj_g[b * H:(b + 1) * H], axis=0) for b in range(B)],
        axis=0) + ob_ref[...]                                # (BS, D)

    # ---- residual 1 ----
    h1 = attn + x

    # ---- linear_norm (no affine) + Linear + ReLU, flattened over B*S ----
    f = jnp.dot(_layer_norm(h1), linw_ref[...],
                preferred_element_type=jnp.float32) + linb_ref[...]
    f = jnp.maximum(f, 0.0)

    # ---- dropout (eval mode -> identity) + residual with the ORIGINAL x,
    #      exactly as in the PyTorch module (`y = y + x`). ----
    # TODO(synk): training-mode dropout (p=0.2) not implemented; eval semantics.
    out = f + x

    # ---- lane-dense store: pad D=32 -> 128 lanes so stores are unmasked ----
    o_ref[...] = jnp.concatenate(
        [out, jnp.zeros((BS, LANE - D), dtype=out.dtype)], axis=-1)


# ----------------------------- wrapper ----------------------------------------
def _prepare_params(p):
    """Free, wrapper-side layout plumbing: pre-transpose / head-arrange weights."""
    scale = 1.0 / math.sqrt(DH)
    w_q, w_k, w_v = jnp.split(p["in_proj_w"], 3, axis=0)     # (D, D) each
    b_q, b_k, b_v = jnp.split(p["in_proj_b"], 3, axis=0)     # (D,) each

    def head_major(w):        # torch (D_out, D_in) -> (H, D_in, DH_out)
        return jnp.transpose(w.reshape(H, DH, D), (0, 2, 1))

    wqkv_h = jnp.concatenate([head_major(w_q) * scale,       # scale folded into q
                              head_major(w_k),
                              head_major(w_v)], axis=-1)     # (H, D, 3*DH)
    bqkv_h = jnp.concatenate([b_q.reshape(H, DH) * scale,
                              b_k.reshape(H, DH),
                              b_v.reshape(H, DH)], axis=-1)  # (H, 3*DH)
    # out_proj as per-head (DH, D) blocks: summing head contributions
    # == concat(heads) @ out_proj.weight.T
    wo_h = jnp.transpose(p["out_proj_w"].reshape(D, H, DH), (1, 2, 0))  # (H, DH, D)

    return dict(
        ln1_w=p["ln1_w"].reshape(1, D),
        ln1_b=p["ln1_b"].reshape(1, D),
        wqkv_g=jnp.tile(wqkv_h, (B, 1, 1)),                  # (B*H, D, 3*DH)
        bqkv_g=jnp.tile(bqkv_h, (B, 1))[:, None, :],         # (B*H, 1, 3*DH)
        wo_g=jnp.tile(wo_h, (B, 1, 1)),                      # (B*H, DH, D)
        out_b=p["out_proj_b"].reshape(1, D),
        lin_w_t=p["lin_w"].T,                                # (D_in, D_out)
        lin_b=p["lin_b"].reshape(1, D),
    )


@jax.jit
def transformer_forward(x, params):
    """x: (B, S, D) float32.  params: PyTorch-layout weights (see init_params)."""
    assert x.shape == (B, S, D)
    kp = _prepare_params(params)
    x2d = x.reshape(BS, D)                                   # free, wrapper-side

    vmem = lambda: pl.BlockSpec(memory_space=pltpu.MemorySpace.VMEM)
    out_padded = pl.pallas_call(
        transformer_kernel,
        out_shape=jax.ShapeDtypeStruct((BS, LANE), x.dtype),
        in_specs=[vmem() for _ in range(9)],
        out_specs=vmem(),
    )(x2d, kp["ln1_w"], kp["ln1_b"], kp["wqkv_g"], kp["bqkv_g"],
      kp["wo_g"], kp["out_b"], kp["lin_w_t"], kp["lin_b"])

    return out_padded[:, :D].reshape(B, S, D)                # drop lane padding


def init_params(key, dim=D):
    """Deterministic synthetic params in the PyTorch module's native layout."""
    assert dim == D
    ks = jax.random.split(key, 8)
    s = 0.05
    return {
        "ln1_w": jnp.ones((dim,), jnp.float32)
                 + s * jax.random.normal(ks[0], (dim,), jnp.float32),
        "ln1_b": s * jax.random.normal(ks[1], (dim,), jnp.float32),
        "in_proj_w": s * jax.random.normal(ks[2], (3 * dim, dim), jnp.float32),
        "in_proj_b": s * jax.random.normal(ks[3], (3 * dim,), jnp.float32),
        "out_proj_w": s * jax.random.normal(ks[4], (dim, dim), jnp.float32),
        "out_proj_b": s * jax.random.normal(ks[5], (dim,), jnp.float32),
        "lin_w": s * jax.random.normal(ks[6], (dim, dim), jnp.float32),
        "lin_b": s * jax.random.normal(ks[7], (dim,), jnp.float32),
    }


if __name__ == "__main__":
    key = jax.random.PRNGKey(0)
    k_x, k_p = jax.random.split(key)

    x = jax.random.normal(k_x, (B, S, D), jnp.float32)
    params = init_params(k_p, D)

    out = transformer_forward(x, params)
    out = jax.block_until_ready(out)

    assert out.shape == (B, S, D) and out.dtype == jnp.float32
    assert bool(jnp.all(jnp.isfinite(out)))
    print("KERNEL_OK")
</pallas_src>

<mosaic_0001>
module attributes {stable_mosaic.version = 11 : i64} {
  func.func @transformer_kernel(%arg0: memref<16x32xf32, #tpu.memory_space<vmem>>, %arg1: memref<1x32xf32, #tpu.memory_space<vmem>>, %arg2: memref<1x32xf32, #tpu.memory_space<vmem>>, %arg3: memref<16x32x12xf32, #tpu.memory_space<vmem>>, %arg4: memref<16x1x12xf32, #tpu.memory_space<vmem>>, %arg5: memref<16x4x32xf32, #tpu.memory_space<vmem>>, %arg6: memref<1x32xf32, #tpu.memory_space<vmem>>, %arg7: memref<32x32xf32, #tpu.memory_space<vmem>>, %arg8: memref<1x32xf32, #tpu.memory_space<vmem>>, %arg9: memref<16x128xf32, #tpu.memory_space<vmem>>) attributes {dimension_semantics = [], scalar_prefetch = 0 : i64, scratch_operands = 0 : i64, tpu.core_type = #tpu.core_type<tc>} {
    %c0 = arith.constant 0 : index
    %c0_0 = arith.constant 0 : index
    %0 = vector.load %arg0[%c0, %c0_0] : memref<16x32xf32, #tpu.memory_space<vmem>>, vector<16x32xf32>
    %cst = arith.constant dense<0.000000e+00> : vector<16xf32>
    %1 = vector.multi_reduction <add>, %0, %cst [1] : vector<16x32xf32> to vector<16xf32>
    %2 = vector.shape_cast %1 : vector<16xf32> to vector<16x1xf32>
    %cst_1 = arith.constant 3.200000e+01 : f32
    %3 = vector.broadcast %cst_1 : f32 to vector<16x1xf32>
    %4 = arith.divf %2, %3 : vector<16x1xf32>
    %5 = vector.broadcast %4 : vector<16x1xf32> to vector<16x32xf32>
    %6 = arith.subf %0, %5 : vector<16x32xf32>
    %7 = arith.mulf %6, %6 : vector<16x32xf32>
    %cst_2 = arith.constant dense<0.000000e+00> : vector<16xf32>
    %8 = vector.multi_reduction <add>, %7, %cst_2 [1] : vector<16x32xf32> to vector<16xf32>
    %9 = vector.shape_cast %8 : vector<16xf32> to vector<16x1xf32>
    %cst_3 = arith.constant 3.200000e+01 : f32
    %10 = vector.broadcast %cst_3 : f32 to vector<16x1xf32>
    %11 = arith.divf %9, %10 : vector<16x1xf32>
    %cst_4 = arith.constant 9.99999974E-6 : f32
    %12 = vector.broadcast %cst_4 : f32 to vector<16x1xf32>
    %13 = arith.addf %11, %12 : vector<16x1xf32>
    %14 = math.rsqrt %13 : vector<16x1xf32>
    %15 = vector.broadcast %14 : vector<16x1xf32> to vector<16x32xf32>
    %16 = arith.mulf %6, %15 : vector<16x32xf32>
    %c0_5 = arith.constant 0 : index
    %c0_6 = arith.constant 0 : index
    %17 = vector.load %arg1[%c0_5, %c0_6] : memref<1x32xf32, #tpu.memory_space<vmem>>, vector<1x32xf32>
    %18 = vector.broadcast %17 : vector<1x32xf32> to vector<16x32xf32>
    %19 = arith.mulf %16, %18 : vector<16x32xf32>
    %c0_7 = arith.constant 0 : index
    %c0_8 = arith.constant 0 : index
    %20 = vector.load %arg2[%c0_7, %c0_8] : memref<1x32xf32, #tpu.memory_space<vmem>>, vector<1x32xf32>
    %21 = vector.broadcast %20 : vector<1x32xf32> to vector<16x32xf32>
    %22 = arith.addf %19, %21 : vector<16x32xf32>
    %23 = vector.extract_strided_slice %22 {offsets = [0, 0], sizes = [8, 32], strides = [1, 1]} : vector<16x32xf32> to vector<8x32xf32>
    %24 = vector.extract_strided_slice %22 {offsets = [8, 0], sizes = [8, 32], strides = [1, 1]} : vector<16x32xf32> to vector<8x32xf32>
    %25 = vector.shape_cast %23 : vector<8x32xf32> to vector<1x8x32xf32>
    %26 = vector.shape_cast %23 : vector<8x32xf32> to vector<1x8x32xf32>
    %27 = vector.shape_cast %23 : vector<8x32xf32> to vector<1x8x32xf32>
    %28 = vector.shape_cast %23 : vector<8x32xf32> to vector<1x8x32xf32>
    %29 = vector.shape_cast %23 : vector<8x32xf32> to vector<1x8x32xf32>
    %30 = vector.shape_cast %23 : vector<8x32xf32> to vector<1x8x32xf32>
    %31 = vector.shape_cast %23 : vector<8x32xf32> to vector<1x8x32xf32>
    %32 = vector.shape_cast %23 : vector<8x32xf32> to vector<1x8x32xf32>
    %33 = vector.shape_cast %24 : vector<8x32xf32> to vector<1x8x32xf32>
    %34 = vector.shape_cast %24 : vector<8x32xf32> to vector<1x8x32xf32>
    %35 = vector.shape_cast %24 : vector<8x32xf32> to vector<1x8x32xf32>
    %36 = vector.shape_cast %24 : vector<8x32xf32> to vector<1x8x32xf32>
    %37 = vector.shape_cast %24 : vector<8x32xf32> to vector<1x8x32xf32>
    %38 = vector.shape_cast %24 : vector<8x32xf32> to vector<1x8x32xf32>
    %39 = vector.shape_cast %24 : vector<8x32xf32> to vector<1x8x32xf32>
    %40 = vector.shape_cast %24 : vector<8x32xf32> to vector<1x8x32xf32>
    %41 = tpu.concatenate %25, %26, %27, %28, %29, %30, %31, %32, %33, %34, %35, %36, %37, %38, %39, %40 in 0 : vector<1x8x32xf32>, vector<1x8x32xf32>, vector<1x8x32xf32>, vector<1x8x32xf32>, vector<1x8x32xf32>, vector<1x8x32xf32>, vector<1x8x32xf32>, vector<1x8x32xf32>, vector<1x8x32xf32>, vector<1x8x32xf32>, vector<1x8x32xf32>, vector<1x8x32xf32>, vector<1x8x32xf32>, vector<1x8x32xf32>, vector<1x8x32xf32>, vector<1x8x32xf32> -> vector<16x8x32xf32>
    %c0_9 = arith.constant 0 : index
    %c0_10 = arith.constant 0 : index
    %c0_11 = arith.constant 0 : index
    %42 = vector.load %arg3[%c0_9, %c0_10, %c0_11] : memref<16x32x12xf32, #tpu.memory_space<vmem>>, vector<16x32x12xf32>
    "tpu.trace_start"() <{level = 10 : i32, message = "gsd,gde->gse"}> : () -> ()
    %cst_12 = arith.constant dense<0.000000e+00> : vector<16x8x12xf32>
    %43 = tpu.matmul %41, %42, %cst_12 {dimension_numbers = #tpu.dot_dimension_numbers<[2], [1], [1], [2], [0, 0, 0, 1, 1, 2], [0], [0]>} : vector<16x8x32xf32>, vector<16x32x12xf32>, vector<16x8x12xf32> -> vector<16x8x12xf32>
    "tpu.trace_stop"() : () -> ()
    %c0_13 = arith.constant 0 : index
    %c0_14 = arith.constant 0 : index
    %c0_15 = arith.constant 0 : index
    %44 = vector.load %arg4[%c0_13, %c0_14, %c0_15] : memref<16x1x12xf32, #tpu.memory_space<vmem>>, vector<16x1x12xf32>
    %45 = vector.broadcast %44 : vector<16x1x12xf32> to vector<16x8x12xf32>
    %46 = arith.addf %43, %45 : vector<16x8x12xf32>
    %47 = vector.extract_strided_slice %46 {offsets = [0, 0, 0], sizes = [16, 8, 4], strides = [1, 1, 1]} : vector<16x8x12xf32> to vector<16x8x4xf32>
    %48 = vector.extract_strided_slice %46 {offsets = [0, 0, 4], sizes = [16, 8, 4], strides = [1, 1, 1]} : vector<16x8x12xf32> to vector<16x8x4xf32>
    %49 = vector.extract_strided_slice %46 {offsets = [0, 0, 8], sizes = [16, 8, 4], strides = [1, 1, 1]} : vector<16x8x12xf32> to vector<16x8x4xf32>
    "tpu.trace_start"() <{level = 10 : i32, message = "gsd,gtd->gst"}> : () -> ()
    %cst_16 = arith.constant dense<0.000000e+00> : vector<16x8x8xf32>
    %50 = tpu.matmul %47, %48, %cst_16 {dimension_numbers = #tpu.dot_dimension_numbers<[2], [2], [1], [1], [0, 0, 0, 1, 1, 1], [0], [0]>} : vector<16x8x4xf32>, vector<16x8x4xf32>, vector<16x8x8xf32> -> vector<16x8x8xf32>
    "tpu.trace_stop"() : () -> ()
    %cst_17 = arith.constant dense<0xFF800000> : vector<16x8xf32>
    %51 = vector.multi_reduction <maximumf>, %50, %cst_17 [2] : vector<16x8x8xf32> to vector<16x8xf32>
    %52 = vector.shape_cast %51 : vector<16x8xf32> to vector<16x8x1xf32>
    %53 = vector.broadcast %52 : vector<16x8x1xf32> to vector<16x8x8xf32>
    %54 = arith.subf %50, %53 : vector<16x8x8xf32>
    %55 = math.exp %54 : vector<16x8x8xf32>
    %cst_18 = arith.constant dense<0.000000e+00> : vector<16x8xf32>
    %56 = vector.multi_reduction <add>, %55, %cst_18 [2] : vector<16x8x8xf32> to vector<16x8xf32>
    %57 = vector.shape_cast %56 : vector<16x8xf32> to vector<16x8x1xf32>
    %58 = tpu.reciprocal %57 {approx = true} : vector<16x8x1xf32> -> vector<16x8x1xf32>
    %59 = vector.broadcast %58 : vector<16x8x1xf32> to vector<16x8x8xf32>
    %60 = arith.mulf %55, %59 : vector<16x8x8xf32>
    "tpu.trace_start"() <{level = 10 : i32, message = "gst,gtd->gsd"}> : () -> ()
    %cst_19 = arith.constant dense<0.000000e+00> : vector<16x8x4xf32>
    %61 = tpu.matmul %60, %49, %cst_19 {dimension_numbers = #tpu.dot_dimension_numbers<[2], [1], [1], [2], [0, 0, 0, 1, 1, 2], [0], [0]>} : vector<16x8x8xf32>, vector<16x8x4xf32>, vector<16x8x4xf32> -> vector<16x8x4xf32>
    "tpu.trace_stop"() : () -> ()
    %c0_20 = arith.constant 0 : index
    %c0_21 = arith.constant 0 : index
    %c0_22 = arith.constant 0 : index
    %62 = vector.load %arg5[%c0_20, %c0_21, %c0_22] : memref<16x4x32xf32, #tpu.memory_space<vmem>>, vector<16x4x32xf32>
    "tpu.trace_start"() <{level = 10 : i32, message = "gsd,gde->gse"}> : () -> ()
    %cst_23 = arith.constant dense<0.000000e+00> : vector<16x8x32xf32>
    %63 = tpu.matmul %61, %62, %cst_23 {dimension_numbers = #tpu.dot_dimension_numbers<[2], [1], [1], [2], [0, 0, 0, 1, 1, 2], [0], [0]>} : vector<16x8x4xf32>, vector<16x4x32xf32>, vector<16x8x32xf32> -> vector<16x8x32xf32>
    "tpu.trace_stop"() : () -> ()
    %64 = vector.extract_strided_slice %63 {offsets = [0, 0, 0], sizes = [8, 8, 32], strides = [1, 1, 1]} : vector<16x8x32xf32> to vector<8x8x32xf32>
    %cst_24 = arith.constant dense<0.000000e+00> : vector<8x32xf32>
    %65 = vector.multi_reduction <add>, %64, %cst_24 [0] : vector<8x8x32xf32> to vector<8x32xf32>
    %66 = vector.extract_strided_slice %63 {offsets = [8, 0, 0], sizes = [8, 8, 32], strides = [1, 1, 1]} : vector<16x8x32xf32> to vector<8x8x32xf32>
    %cst_25 = arith.constant dense<0.000000e+00> : vector<8x32xf32>
    %67 = vector.multi_reduction <add>, %66, %cst_25 [0] : vector<8x8x32xf32> to vector<8x32xf32>
    %68 = tpu.concatenate %65, %67 in 0 : vector<8x32xf32>, vector<8x32xf32> -> vector<16x32xf32>
    %c0_26 = arith.constant 0 : index
    %c0_27 = arith.constant 0 : index
    %69 = vector.load %arg6[%c0_26, %c0_27] : memref<1x32xf32, #tpu.memory_space<vmem>>, vector<1x32xf32>
    %70 = vector.broadcast %69 : vector<1x32xf32> to vector<16x32xf32>
    %71 = arith.addf %68, %70 : vector<16x32xf32>
    %72 = arith.addf %71, %0 : vector<16x32xf32>
    %cst_28 = arith.constant dense<0.000000e+00> : vector<16xf32>
    %73 = vector.multi_reduction <add>, %72, %cst_28 [1] : vector<16x32xf32> to vector<16xf32>
    %74 = vector.shape_cast %73 : vector<16xf32> to vector<16x1xf32>
    %cst_29 = arith.constant 3.200000e+01 : f32
    %75 = vector.broadcast %cst_29 : f32 to vector<16x1xf32>
    %76 = arith.divf %74, %75 : vector<16x1xf32>
    %77 = vector.broadcast %76 : vector<16x1xf32> to vector<16x32xf32>
    %78 = arith.subf %72, %77 : vector<16x32xf32>
    %79 = arith.mulf %78, %78 : vector<16x32xf32>
    %cst_30 = arith.constant dense<0.000000e+00> : vector<16xf32>
    %80 = vector.multi_reduction <add>, %79, %cst_30 [1] : vector<16x32xf32> to vector<16xf32>
    %81 = vector.shape_cast %80 : vector<16xf32> to vector<16x1xf32>
    %cst_31 = arith.constant 3.200000e+01 : f32
    %82 = vector.broadcast %cst_31 : f32 to vector<16x1xf32>
    %83 = arith.divf %81, %82 : vector<16x1xf32>
    %cst_32 = arith.constant 9.99999974E-6 : f32
    %84 = vector.broadcast %cst_32 : f32 to vector<16x1xf32>
    %85 = arith.addf %83, %84 : vector<16x1xf32>
    %86 = math.rsqrt %85 : vector<16x1xf32>
    %87 = vector.broadcast %86 : vector<16x1xf32> to vector<16x32xf32>
    %88 = arith.mulf %78, %87 : vector<16x32xf32>
    %c0_33 = arith.constant 0 : index
    %c0_34 = arith.constant 0 : index
    %89 = vector.load %arg7[%c0_33, %c0_34] : memref<32x32xf32, #tpu.memory_space<vmem>>, vector<32x32xf32>
    %cst_35 = arith.constant dense<0.000000e+00> : vector<16x32xf32>
    %90 = tpu.matmul %88, %89, %cst_35 {dimension_numbers = #tpu.dot_dimension_numbers<[1], [0], [0], [1], [0, 0, 1, 1], [], []>} : vector<16x32xf32>, vector<32x32xf32>, vector<16x32xf32> -> vector<16x32xf32>
    %c0_36 = arith.constant 0 : index
    %c0_37 = arith.constant 0 : index
    %91 = vector.load %arg8[%c0_36, %c0_37] : memref<1x32xf32, #tpu.memory_space<vmem>>, vector<1x32xf32>
    %92 = vector.broadcast %91 : vector<1x32xf32> to vector<16x32xf32>
    %93 = arith.addf %90, %92 : vector<16x32xf32>
    %cst_38 = arith.constant 0.000000e+00 : f32
    %94 = vector.broadcast %cst_38 : f32 to vector<16x32xf32>
    %95 = arith.maximumf %93, %94 : vector<16x32xf32>
    %96 = arith.addf %95, %0 : vector<16x32xf32>
    %cst_39 = arith.constant 0.000000e+00 : f32
    %97 = vector.broadcast %cst_39 : f32 to vector<16x96xf32>
    %98 = tpu.concatenate %96, %97 in 1 : vector<16x32xf32>, vector<16x96xf32> -> vector<16x128xf32>
    %c0_40 = arith.constant 0 : index
    %c0_41 = arith.constant 0 : index
    %99 = vector.load %arg9[%c0_40, %c0_41] : memref<16x128xf32, #tpu.memory_space<vmem>>, vector<16x128xf32>
    tpu.vector_store %arg9[%c0_40, %c0_41], %98 {strides = array<i32>} : memref<16x128xf32, #tpu.memory_space<vmem>>, vector<16x128xf32>,
    return
  }
}

</mosaic_0001>

<bundles_post_ra>
// kernel: transformer_forward.1
= control target key start
LH: loop header
LB: loop body
LE: loop exit
PB: predicated region body
PF: predicated region fallthrough
CT: control target
= control target key end

     0   :  { %vm34_vm0 = vcmask 261120   ;;  %v2379_v4 = vmov 32.0   ;;  %s2380_s15 = smov 124   ;;  %s2381_s18 = smov 120   ;;  %vm555_vm8 = vcmask 31744   ;;  %vm985_vm9 = vcmask 64512   ;;  %s3146_s0 = inlined_call_operand.vmem [shape: f32[16,32], index: 0, kind: input, shape index: {}]   ;;  %s3147_s1 = inlined_call_operand.vmem [shape: f32[1,32], index: 1, kind: input, shape index: {}]   ;;  %s3148_s2 = inlined_call_operand.vmem [shape: f32[1,32], index: 2, kind: input, shape index: {}]   ;;  %s3149_s4 = inlined_call_operand.vmem [shape: f32[16,1,12], index: 4, kind: input, shape index: {}]   ;;  %s3150_s3 = inlined_call_operand.vmem [shape: f32[16,32,12], index: 3, kind: input, shape index: {}]   ;;  %s3151_s5 = inlined_call_operand.vmem [shape: f32[16,4,32], index: 5, kind: input, shape index: {}]   ;;  %s3152_s6 = inlined_call_operand.vmem [shape: f32[1,32], index: 6, kind: input, shape index: {}]   ;;  %s3153_s8 = inlined_call_operand.vmem [shape: f32[1,32], index: 8, kind: input, shape index: {}]   ;;  %s3154_s7 = inlined_call_operand.vmem [shape: f32[32,32], index: 7, kind: input, shape index: {}]   ;;  %s3155_s9 = inlined_call_operand.vmem [shape: f32[16,128], index: 9, kind: output, shape index: {}]  }
   0x1   :  { %v32_v0 = vld [vmem:[%s3146_s0] sm:$0xff]  ;;  %v33_v2 = vld [vmem:[%s3146_s0 + $0x8] sm:$0xff]  ;;  %2303 = vrcp.f32 %v2379_v4  ;;  %v101_v21 = vld [vmem:[%s3150_s3 + $0x18] sm:$0xff]  ;;  %vm1597_vm10 = vcmask 1043456  }
   0x2   :  { %v35_v1 = vsel %vm34_vm0, %v32_v0, 0.0  ;;  %v38_v3 = vsel %vm34_vm0, %v33_v2, 0.0  ;;  %v109_v22 = vld [vmem:[%s3150_s3 + $0x58] sm:$0xff]  ;;  %241 = vmatpush.msra.mxu1 %v101_v21  ;;  %v100_v25 = vld [vmem:[%s3150_s3 + $0x10] sm:$0xff]  ;;  %v99_v29 = vld [vmem:[%s3150_s3 + $0x8] sm:$0xff] }
   0x3   :  { %36 = vadd.xlane.f32.xlu0 %v35_v1  ;;  %v113_v23 = vld [vmem:[%s3150_s3 + $0x78] sm:$0xff]  ;;  %281 = vmatpush.msra.mxu2 %v109_v22  ;;  %v108_v26 = vld [vmem:[%s3150_s3 + $0x50] sm:$0xff]  ;;  %v107_v30 = vld [vmem:[%s3150_s3 + $0x48] sm:$0xff] }
   0x4   :  { %v117_v24 = vld [vmem:[%s3150_s3 + $0x98] sm:$0xff]  ;;  %301 = vmatpush.msra.mxu3 %v113_v23  ;;  %v112_v27 = vld [vmem:[%s3150_s3 + $0x70] sm:$0xff]  ;;  %242 = vmatpush.msra.mxu1 %v100_v25  ;;  %v111_v31 = vld [vmem:[%s3150_s3 + $0x68] sm:$0xff] }
   0x5   :  { %321 = vmatpush.msra.mxu0 %v117_v24  ;;  %282 = vmatpush.msra.mxu2 %v108_v26  ;;  %v116_v28 = vld [vmem:[%s3150_s3 + $0x90] sm:$0xff]  ;;  %v115_v32 = vld [vmem:[%s3150_s3 + $0x88] sm:$0xff]  ;;  %v98_v33 = vld [vmem:[%s3150_s3] sm:$0xff] }
   0x6   :  { %302 = vmatpush.msra.mxu3 %v112_v27  ;;  %243 = vmatpush.msra.mxu1 %v99_v29  ;;  %v106_v34 = vld [vmem:[%s3150_s3 + $0x40] sm:$0xff]  ;;  %v105_v37 = vld [vmem:[%s3150_s3 + $0x38] sm:$0xff]  ;;  %v104_v42 = vld [vmem:[%s3150_s3 + $0x30] sm:$0xff] }
   0x7   :  { %v2304_v5 = vpop.eup %2303  ;;  %322 = vmatpush.msra.mxu0 %v116_v28  ;;  %283 = vmatpush.msra.mxu2 %v107_v30  ;;  %v110_v35 = vld [vmem:[%s3150_s3 + $0x60] sm:$0xff]  ;;  %v125_v38 = vld [vmem:[%s3150_s3 + $0xd8] sm:$0xff]  ;;  %v124_v43 = vld [vmem:[%s3150_s3 + $0xd0] sm:$0xff] }
   0x8   :  { %v42_v6 = vmul.f32 32.0, %v2304_v5  ;;  %vm46_vm1 = vweird.f32 %v2304_v5  ;;  %303 = vmatpush.msra.mxu3 %v111_v31  ;;  %244 = vmatpush.msra.mxu1 %v98_v33  ;;  %v114_v36 = vld [vmem:[%s3150_s3 + $0x80] sm:$0xff]  ;;  %v129_v39 = vld [vmem:[%s3150_s3 + $0xf8] sm:$0xff]  ;;  %v128_v44 = vld [vmem:[%s3150_s3 + $0xf0] sm:$0xff] }
   0x9   :  { %323 = vmatpush.msra.mxu0 %v115_v32  ;;  %284 = vmatpush.msra.mxu2 %v106_v34  ;;  %v133_v40 = vld [vmem:[%s3150_s3 + $0x118] sm:$0xff]  ;;  %v132_v46 = vld [vmem:[%s3150_s3 + $0x110] sm:$0xff]  ;;  %v103_v47 = vld [vmem:[%s3150_s3 + $0x28] sm:$0xff] }
   0xa   :  { %v43_v7 = vsub.f32 1.0, %v42_v6  ;;  %304 = vmatpush.msra.mxu3 %v110_v35  ;;  %261 = vmatpush.msrb.mxu1 %v105_v37  ;;  %v123_v48 = vld [vmem:[%s3150_s3 + $0xc8] sm:$0xff]  ;;  %v102_v52 = vld [vmem:[%s3150_s3 + $0x20] sm:$0xff]  ;;  %v140_v21 = vld [vmem:[%s3150_s3 + $0x150] sm:$0xff] }
   0xb   :  { %39 = vadd.xlane.f32.xlu0 %v38_v3  ;;  %324 = vmatpush.msra.mxu0 %v114_v36  ;;  %v127_v49 = vld [vmem:[%s3150_s3 + $0xe8] sm:$0xff]  ;;  %v122_v53 = vld [vmem:[%s3150_s3 + $0xc0] sm:$0xff]  ;;  %v144_v23 = vld [vmem:[%s3150_s3 + $0x170] sm:$0xff] }
   0xc   :  { %v44_v8 = vmul.f32 %v2304_v5, %v43_v7  ;;  %361 = vmatpush.msrb.mxu2 %v125_v38  ;;  %381 = vmatpush.msrb.mxu3 %v129_v39  ;;  %v131_v51 = vld [vmem:[%s3150_s3 + $0x108] sm:$0xff]  ;;  %v126_v54 = vld [vmem:[%s3150_s3 + $0xe0] sm:$0xff]  ;;  %v148_v24 = vld [vmem:[%s3150_s3 + $0x190] sm:$0xff] }
   0xd   :  { %404 = vmatpush.msrb.mxu0 %v133_v40  ;;  %262 = vmatpush.msrb.mxu1 %v104_v42  ;;  %v130_v55 = vld [vmem:[%s3150_s3 + $0x100] sm:$0xff]  ;;  %v119_v25 = vld [vmem:[%s3150_s3 + $0xa8] sm:$0xff]  ;;  %v137_v34 = vld [vmem:[%s3150_s3 + $0x138] sm:$0xff] }
   0xe   :  { %v45_v9 = vadd.f32 %v2304_v5, %v44_v8  ;;  %362 = vmatpush.msrb.mxu2 %v124_v43  ;;  %382 = vmatpush.msrb.mxu3 %v128_v44  ;;  %v2283_v3 = vld [vmem:[%s3147_s1] ss:$0 sm:$0xff]  ;;  %v143_v27 = vld [vmem:[%s3150_s3 + $0x168] sm:$0xff]  ;;  %v157_v35 = vld [vmem:[%s3150_s3 + $0x1d8] sm:$0xff] }
   0xf   :  { %405 = vmatpush.msrb.mxu0 %v132_v46  ;;  %263 = vmatpush.msrb.mxu1 %v103_v47  ;;  %v2284_v6 = vld [vmem:[%s3148_s2] ss:$0 sm:$0xff]  ;;  %v147_v28 = vld [vmem:[%s3150_s3 + $0x188] sm:$0xff]  ;;  %v161_v36 = vld [vmem:[%s3150_s3 + $0x1f8] sm:$0xff] }
  0x10   :  { %v2440_v10 = vsel %vm46_vm1, %v2304_v5, %v45_v9  ;;  %363 = vmatpush.msrb.mxu2 %v123_v48  ;;  %383 = vmatpush.msrb.mxu3 %v127_v49  ;;  %v118_v30 = vld [vmem:[%s3150_s3 + $0xa0] sm:$0xff]  ;;  %v136_v37 = vld [vmem:[%s3150_s3 + $0x130] sm:$0xff]  ;;  %v135_v40 = vld [vmem:[%s3150_s3 + $0x128] sm:$0xff] }
  0x11   :  { %406 = vmatpush.msrb.mxu0 %v131_v51  ;;  %264 = vmatpush.msrb.mxu1 %v102_v52  ;;  %v138_v31 = vld [vmem:[%s3150_s3 + $0x140] sm:$0xff]  ;;  %v156_v38 = vld [vmem:[%s3150_s3 + $0x1d0] sm:$0xff]  ;;  %v159_v42 = vld [vmem:[%s3150_s3 + $0x1e8] sm:$0xff] }
  0x12   :  { %364 = vmatpush.msrb.mxu2 %v122_v53  ;;  %384 = vmatpush.msrb.mxu3 %v126_v54  ;;  %v142_v32 = vld [vmem:[%s3150_s3 + $0x160] sm:$0xff]  ;;  %v160_v39 = vld [vmem:[%s3150_s3 + $0x1f0] sm:$0xff]  ;;  %v153_v46 = vld [vmem:[%s3150_s3 + $0x1b8] sm:$0xff] }
  0x13   :  { %407 = vmatpush.msrb.mxu0 %v130_v55  ;;  %v146_v33 = vld [vmem:[%s3150_s3 + $0x180] sm:$0xff]  ;;  %v152_v47 = vld [vmem:[%s3150_s3 + $0x1b0] sm:$0xff]  ;;  %v151_v48 = vld [vmem:[%s3150_s3 + $0x1a8] sm:$0xff] }
  0x14   :  { %v134_v43 = vld [vmem:[%s3150_s3 + $0x120] sm:$0xff] }
  0x15   :  { %v154_v44 = vld [vmem:[%s3150_s3 + $0x1c0] sm:$0xff] }
  0x16   :  { %v150_v49 = vld [vmem:[%s3150_s3 + $0x1a0] sm:$0xff] }
  0x17   :  { %v2287_v51 = vld [vmem:[%s3149_s4 + $0x2] ss:$0 sm:$0xff] }
  0x76   :  { %v37_v11 = vpop.xlane.xlu0 %36 }
  0x77   :  { %v48_v12 = vmul.f32 %v2440_v10, %v37_v11 }
  0x79   :  { %v2443_v13 = vsub.f32 %v32_v0, %v48_v12 }
  0x7b   :  { %v52_v14 = vmul.f32 %v2443_v13, %v2443_v13 }
  0x7d   :  { %v54_v15 = vsel %vm34_vm0, %v52_v14, 0.0 }
  0x7e   :  { %55 = vadd.xlane.f32.xlu1 %v54_v15  ;;  %v40_v16 = vpop.xlane.xlu0 %39  ;;  %v121_v15 = vld [vmem:[%s3150_s3 + $0xb8] sm:$0xff] }
  0x7f   :  { %v49_v17 = vmul.f32 %v2440_v10, %v40_v16  ;;  %v141_v16 = vld [vmem:[%s3150_s3 + $0x158] sm:$0xff] }
  0x81   :  { %v2449_v18 = vsub.f32 %v33_v2, %v49_v17  ;;  %v149_v17 = vld [vmem:[%s3150_s3 + $0x198] sm:$0xff] }
  0x83   :  { %v53_v19 = vmul.f32 %v2449_v18, %v2449_v18 }
  0x85   :  { %v57_v20 = vsel %vm34_vm0, %v53_v19, 0.0 }
  0x86   :  { %58 = vadd.xlane.f32.xlu1 %v57_v20  ;;  %v120_v20 = vld [vmem:[%s3150_s3 + $0xb0] sm:$0xff] }
  0xf1   :  { %v56_v41 = vpop.xlane.xlu1 %55 }
  0xf2   :  { %v60_v45 = vmul.f32 %v56_v41, %v2440_v10  ;;  %v155_v41 = vld [vmem:[%s3150_s3 + $0x1c8] sm:$0xff] }
  0xf4   :  { %v62_v50 = vadd.f32 1e-05, %v60_v45  ;;  %v158_v45 = vld [vmem:[%s3150_s3 + $0x1e0] sm:$0xff] }
  0xf6   :  { %2305 = vrsqrt.f32 %v62_v50  ;;  %vm70_vm3 = vweird.f32 %v62_v50 }
  0xf9   :  { %v59_v56 = vpop.xlane.xlu1 %58 }
  0xfa   :  { %v61_v57 = vmul.f32 %v59_v56, %v2440_v10  ;;  %v2288_v56 = vld [vmem:[%s3149_s4 + $0x3] ss:$0 sm:$0xff] }
  0xfc   :  { %v2306_v58 = vpop.eup %2305  ;;  %v63_v59 = vadd.f32 1e-05, %v61_v57  ;;  %v2291_v57 = vld [vmem:[%s3149_s4 + $0x6] ss:$0 sm:$0xff] }
  0xfd   :  { %v65_v60 = vmul.f32 %v2306_v58, %v62_v50  ;;  %vm71_vm2 = vweird.f32 %v2306_v58 }
  0xfe   :  { %2307 = vrsqrt.f32 %v63_v59  ;;  %vm72_vm4 = vmor %vm70_vm3, %vm71_vm2  ;;  %vm80_vm5 = vweird.f32 %v63_v59 }
  0xff   :  { %v66_v61 = vmul.f32 %v2306_v58, %v65_v60 }
 0x101   :  { %v67_v62 = vmul.f32 0.5, %v66_v61 }
 0x103   :  { %v68_v63 = vsub.f32 1.5, %v67_v62 }
 0x104   :  { %v2308_v0 = vpop.eup %2307 }
 0x105   :  { %v69_v1 = vmul.f32 %v2306_v58, %v68_v63  ;;  %v75_v2 = vmul.f32 %v2308_v0, %v63_v59  ;;  %vm81_vm6 = vweird.f32 %v2308_v0 }
 0x106   :  { %vm82_vm7 = vmor %vm80_vm5, %vm81_vm6 }
 0x107   :  { %v73_v4 = vsel %vm72_vm4, %v2306_v58, %v69_v1  ;;  %v76_v5 = vmul.f32 %v2308_v0, %v75_v2  ;;  %v2292_v58 = vld [vmem:[%s3149_s4 + $0x7] ss:$0 sm:$0xff]  ;;  %v2285_v1 = vld [vmem:[%s3149_s4] ss:$0 sm:$0xff] }
 0x108   :  { %v84_v7 = vmul.f32 %v73_v4, %v2443_v13  ;;  %v145_v13 = vld [vmem:[%s3150_s3 + $0x178] sm:$0xff]  ;;  %v2296_v4 = vld [vmem:[%s3149_s4 + $0xb] ss:$0 sm:$0xff] }
 0x109   :  { %v77_v8 = vmul.f32 0.5, %v76_v5 }
 0x10a   :  { %v90_v9 = vmul.f32 %v2283_v3, %v84_v7 }
 0x10b   :  { %v78_v11 = vsub.f32 1.5, %v77_v8 }
 0x10c   :  { %v96_v12 = vadd.f32 %v2284_v6, %v90_v9 }
 0x10d   :  { %v79_v14 = vmul.f32 %v2308_v0, %v78_v11  ;;  %v2289_v11 = vld [vmem:[%s3149_s4 + $0x1] ss:$0 sm:$0xff] }
 0x10e   :  { %2142 = vmatmul.msk.f32.vlgmr.msra.gmra.mxu1 %vm34_vm0, %v96_v12  ;;  %2144 = vmatmul.msk.f32.vlgmr.msra.gmra.mxu2 %vm34_vm0, %v96_v12 }
 0x10f   :  { %v83_v19 = vsel %vm82_vm7, %v2308_v0, %v79_v14  ;;  %2145 = vmatmul.msk.f32.vlgmr.msra.gmra.mxu3 %vm34_vm0, %v96_v12  ;;  %2146 = vmatmul.msk.f32.vlgmr.msra.gmra.mxu0 %vm34_vm0, %v96_v12  ;;  %v2298_v14 = vld [vmem:[%s3149_s4 + $0xe] ss:$0 sm:$0xff] }
 0x110   :  { %v85_v22 = vmul.f32 %v83_v19, %v2449_v18  ;;  %341 = vmatpush.msra.mxu1 %v121_v15  ;;  %444 = vmatpush.msra.mxu2 %v141_v16  ;;  %v139_v18 = vld [vmem:[%s3150_s3 + $0x148] sm:$0xff] }
 0x111   :  { %464 = vmatpush.msra.mxu3 %v145_v13  ;;  %484 = vmatpush.msra.mxu0 %v149_v17  ;;  %v2290_v15 = vld [vmem:[%s3149_s4 + $0x8] ss:$0 sm:$0xff] }
 0x112   :  { %v91_v26 = vmul.f32 %v2283_v3, %v85_v22  ;;  %342 = vmatpush.msra.mxu1 %v120_v20  ;;  %445 = vmatpush.msra.mxu2 %v140_v21  ;;  %v2293_v3 = vld [vmem:[%s3149_s4 + $0x5] ss:$0 sm:$0xff]  ;;  %v2295_v21 = vld [vmem:[%s3149_s4 + $0xa] ss:$0 sm:$0xff]  ;;  %v2297_v22 = vld [vmem:[%s3149_s4 + $0x9] ss:$0 sm:$0xff] }
 0x113   :  { %465 = vmatpush.msra.mxu3 %v144_v23  ;;  %485 = vmatpush.msra.mxu0 %v148_v24  ;;  %v2300_v23 = vld [vmem:[%s3149_s4 + $0xd] ss:$0 sm:$0xff] }
 0x114   :  { %v97_v29 = vadd.f32 %v2284_v6, %v91_v26  ;;  %343 = vmatpush.msra.mxu1 %v119_v25  ;;  %446 = vmatpush.msra.mxu2 %v139_v18 }
 0x115   :  { %466 = vmatpush.msra.mxu3 %v143_v27  ;;  %486 = vmatpush.msra.mxu0 %v147_v28  ;;  %v2286_v27 = vld [vmem:[%s3149_s4 + $0x4] ss:$0 sm:$0xff] }
 0x116   :  { %2143 = vmatmul.msk.f32.vlgmr.msrb.gmra.mxu1 %vm34_vm0, %v96_v12  ;;  %2148 = vmatmul.msk.f32.vlgmr.msrb.gmra.mxu2 %vm34_vm0, %v96_v12 }
 0x117   :  { %2149 = vmatmul.msk.f32.vlgmr.msrb.gmra.mxu3 %vm34_vm0, %v96_v12  ;;  %2150 = vmatmul.msk.f32.vlgmr.msrb.gmra.mxu0 %vm34_vm0, %v97_v29 }
 0x118   :  { %344 = vmatpush.msra.mxu1 %v118_v30  ;;  %447 = vmatpush.msra.mxu2 %v138_v31  ;;  %v2299_v31 = vld [vmem:[%s3149_s4 + $0xf] ss:$0 sm:$0xff] }
 0x119   :  { %467 = vmatpush.msra.mxu3 %v142_v32  ;;  %487 = vmatpush.msra.mxu0 %v146_v33 }
 0x11a   :  { %424 = vmatpush.msrb.mxu1 %v137_v34  ;;  %524 = vmatpush.msrb.mxu2 %v157_v35  ;;  %v2294_v35 = vld [vmem:[%s3149_s4 + $0xc] ss:$0 sm:$0xff] }
 0x11b   :  { %544 = vmatpush.msrb.mxu3 %v161_v36 }
 0x11c   :  { %425 = vmatpush.msrb.mxu1 %v136_v37  ;;  %525 = vmatpush.msrb.mxu2 %v156_v38 }
 0x11d   :  { %545 = vmatpush.msrb.mxu3 %v160_v39 }
 0x11e   :  { %2147 = vmatmul.msk.f32.vlgmr.msra.gmra.mxu1 %vm34_vm0, %v96_v12  ;;  %2152 = vmatmul.msk.f32.vlgmr.msra.gmra.mxu2 %vm34_vm0, %v97_v29 }
 0x11f   :  { %2153 = vmatmul.msk.f32.vlgmr.msra.gmra.mxu3 %vm34_vm0, %v97_v29  ;;  %2154 = vmatmul.msk.f32.vlgmr.msra.gmra.mxu0 %vm34_vm0, %v97_v29 }
 0x120   :  { %426 = vmatpush.msrb.mxu1 %v135_v40  ;;  %526 = vmatpush.msrb.mxu2 %v155_v41 }
 0x121   :  { %546 = vmatpush.msrb.mxu3 %v159_v42 }
 0x122   :  { %427 = vmatpush.msrb.mxu1 %v134_v43  ;;  %527 = vmatpush.msrb.mxu2 %v154_v44 }
 0x123   :  { %547 = vmatpush.msrb.mxu3 %v158_v45 }
 0x124   :  { %504 = vmatpush.msra.mxu1 %v153_v46 }
 0x126   :  { %505 = vmatpush.msra.mxu1 %v152_v47  ;;  %2156 = vmatmul.msk.f32.vlgmr.msrb.gmra.mxu2 %vm34_vm0, %v97_v29 }
 0x127   :  { %2151 = vmatmul.msk.f32.vlgmr.msrb.gmra.mxu1 %vm34_vm0, %v97_v29  ;;  %2157 = vmatmul.msk.f32.vlgmr.msrb.gmra.mxu3 %vm34_vm0, %v97_v29 }
 0x128   :  { %506 = vmatpush.msra.mxu1 %v151_v48 }
 0x12a   :  { %507 = vmatpush.msra.mxu1 %v150_v49 }
 0x12f   :  { %2155 = vmatmul.msk.f32.vlgmr.msra.gmra.mxu1 %vm34_vm0, %v97_v29 }
 0x18b   :  { %v246_v50 = vpop.f32.mrf.mxu1 }
 0x18c   :  { %v326_v2 = vpop.f32.mrf.mxu0  ;;  %v247_v6 = vadd.f32 %v2285_v1, %v246_v50 }
 0x18d   :  { %v327_v28 = vadd.f32 %v2286_v27, %v326_v2 }
 0x191   :  { %v286_v52 = vpop.f32.mrf.mxu2 }
 0x192   :  { %v2675_v53 = vadd.f32 %v2287_v51, %v286_v52  ;;  %v306_v54 = vpop.f32.mrf.mxu3 }
 0x193   :  { %v266_v55 = vpop.f32.mrf.mxu1  ;;  %v2688_v60 = vadd.f32 %v2288_v56, %v306_v54 }
 0x194   :  { %608 = vrot.lane.b32.xlu2 %v2675_v53, %s2380_s15  ;;  %v409_v16 = vpop.f32.mrf.mxu0  ;;  %v267_v17 = vadd.f32 %v2289_v11, %v266_v55 }
 0x195   :  { %v2729_v20 = vadd.f32 %v2290_v15, %v409_v16  ;;  %v2243_v30 = vpack.i.bf16 %v2688_v60, %v2675_v53 }
 0x199   :  { %v366_v59 = vpop.f32.mrf.mxu2 }
 0x19a   :  { %v2690_v61 = vadd.f32 %v2291_v57, %v366_v59  ;;  %v386_v62 = vpop.f32.mrf.mxu3 }
 0x19b   :  { %v2692_v63 = vadd.f32 %v2292_v58, %v386_v62  ;;  %v346_v0 = vpop.f32.mrf.mxu1 }
 0x19c   :  { %716 = vrot.lane.b32.xlu0 %v2690_v61, %s2380_s15  ;;  %635 = vrot.lane.b32.xlu2 %v2688_v60, %s2380_s15  ;;  %v2709_v8 = vadd.f32 %v2293_v3, %v346_v0  ;;  %v2248_v29 = vpack.i.bf16 %v2690_v61, %v247_v6  ;;  %v489_v36 = vpop.f32.mrf.mxu0 }
 0x19d   :  { %743 = vrot.lane.b32.xlu1 %v2692_v63, %s2380_s15  ;;  %v2774_v37 = vadd.f32 %v2294_v35, %v489_v36  ;;  %v2253_v38 = vpack.i.bf16 %v2692_v63, %v267_v17 }
 0x1a1   :  { %v449_v5 = vpop.f32.mrf.mxu2 }
 0x1a2   :  { %v469_v7 = vpop.f32.mrf.mxu3  ;;  %v450_v25 = vadd.f32 %v2295_v21, %v449_v5 }
 0x1a3   :  { %v2711_v9 = vadd.f32 %v2296_v4, %v469_v7 }
 0x1a4   :  { %553 = vrot.lane.b32.xlu2 %v247_v6, %s2380_s15  ;;  %v429_v12 = vpop.f32.mrf.mxu1  ;;  %v2258_v34 = vpack.i.bf16 %v450_v25, %v327_v28 }
 0x1a5   :  { %689 = vrot.lane.b32.xlu1 %v2709_v8, %s2380_s15  ;;  %851 = vrot.lane.b32.xlu0 %v2711_v9, %s2380_s15  ;;  %v2745_v18 = vadd.f32 %v2297_v22, %v429_v12 }
 0x1a9   :  { %v529_v13 = vpop.f32.mrf.mxu2 }
 0x1aa   :  { %v2727_v19 = vadd.f32 %v2298_v14, %v529_v13  ;;  %v549_v32 = vpop.f32.mrf.mxu3 }
 0x1ab   :  { %v2766_v33 = vadd.f32 %v2299_v31, %v549_v32 }
 0x1ac   :  { %581 = vrot.lane.b32.xlu2 %v267_v17, %s2380_s15  ;;  %v509_v24 = vpop.f32.mrf.mxu1 }
 0x1ad   :  { %932 = vrot.lane.b32.xlu0 %v2727_v19, %s2380_s15  ;;  %770 = vrot.lane.b32.xlu1 %v2729_v20, %s2380_s15  ;;  %v2747_v26 = vadd.f32 %v2300_v23, %v509_v24 }
 0x1b4   :  { %824 = vrot.lane.b32.xlu2 %v450_v25, %s2380_s15 }
 0x1b5   :  { %797 = vrot.lane.b32.xlu0 %v2745_v18, %s2380_s15  ;;  %905 = vrot.lane.b32.xlu1 %v2747_v26, %s2380_s15 }
 0x1bc   :  { %662 = vrot.lane.b32.xlu2 %v327_v28, %s2380_s15 }
 0x1bd   :  { %2249 = vrot.lane.b32.xlu0 %v2248_v29, %s2381_s18  ;;  %2244 = vrot.lane.b32.xlu1 %v2243_v30, %s2381_s18 }
 0x1c4   :  { %959 = vrot.lane.b32.xlu2 %v2766_v33, %s2380_s15 }
 0x1c5   :  { %2259 = vrot.lane.b32.xlu1 %v2258_v34, %s2381_s18 }
 0x1cc   :  { %878 = vrot.lane.b32.xlu2 %v2774_v37, %s2380_s15 }
 0x1d4   :  { %2254 = vrot.lane.b32.xlu2 %v2253_v38, %s2381_s18 }
 0x1ee   :  { %v609_v39 = vpop.permute.xlu2 %608 }
 0x1ef   :  { %2162 = vmatpush.xpose.msk.msra.mxu2 %vm555_vm8, %v609_v39 }
 0x1f2   :  { %2163 = vmatmul.msk.f32.vlgmr.msra.gmra.mxu2 %vm555_vm8, %v2675_v53 }
 0x1f6   :  { %v636_v40 = vpop.permute.xlu2 %635 }
 0x1f7   :  { %2164 = vmatpush.xpose.msk.msra.mxu3 %vm555_vm8, %v636_v40 }
 0x1fa   :  { %2165 = vmatmul.msk.f32.vlgmr.msra.gmra.mxu3 %vm555_vm8, %v2688_v60 }
 0x1fe   :  { %v554_v41 = vpop.permute.xlu2 %553 }
 0x1ff   :  { %2158 = vmatpush.xpose.msk.msrb.mxu0 %vm555_vm8, %v554_v41 }
 0x202   :  { %2159 = vmatmul.msk.f32.vlgmr.msrb.gmra.mxu0 %vm555_vm8, %v247_v6 }
 0x206   :  { %v582_v42 = vpop.permute.xlu2 %581 }
 0x207   :  { %2160 = vmatpush.xpose.msk.msrb.mxu1 %vm555_vm8, %v582_v42 }
 0x20a   :  { %2161 = vmatmul.msk.f32.vlgmr.msrb.gmra.mxu1 %vm555_vm8, %v267_v17 }
 0x20e   :  { %v825_v43 = vpop.permute.xlu2 %824  ;;  %v717_v44 = vpop.permute.xlu0 %716 }
 0x20f   :  { %v744_v45 = vpop.permute.xlu1 %743  ;;  %2170 = vmatpush.xpose.msk.msrb.mxu2 %vm555_vm8, %v717_v44 }
 0x210   :  { %2172 = vmatpush.xpose.msk.msrb.mxu3 %vm555_vm8, %v744_v45 }
 0x212   :  { %2171 = vmatmul.msk.f32.vlgmr.msrb.gmra.mxu2 %vm555_vm8, %v2690_v61 }
 0x213   :  { %2178 = vmatpush.xpose.msk.msra.mxu2 %vm555_vm8, %v825_v43  ;;  %2173 = vmatmul.msk.f32.vlgmr.msrb.gmra.mxu3 %vm555_vm8, %v2692_v63 }
 0x216   :  { %v663_v46 = vpop.permute.xlu2 %662 }
 0x217   :  { %v690_v47 = vpop.permute.xlu1 %689  ;;  %v852_v48 = vpop.permute.xlu0 %851  ;;  %2166 = vmatpush.xpose.msk.msra.mxu0 %vm555_vm8, %v663_v46 }
 0x218   :  { %2168 = vmatpush.xpose.msk.msra.mxu1 %vm555_vm8, %v690_v47  ;;  %2180 = vmatpush.xpose.msk.msra.mxu3 %vm555_vm8, %v852_v48 }
 0x21a   :  { %2167 = vmatmul.msk.f32.vlgmr.msra.gmra.mxu0 %vm555_vm8, %v327_v28  ;;  %2179 = vmatmul.msk.f32.vlgmr.msra.gmra.mxu2 %vm555_vm8, %v450_v25 }
 0x21b   :  { %2169 = vmatmul.msk.f32.vlgmr.msra.gmra.mxu1 %vm555_vm8, %v2709_v8  ;;  %2181 = vmatmul.msk.f32.vlgmr.msra.gmra.mxu3 %vm555_vm8, %v2711_v9 }
 0x21e   :  { %v960_v49 = vpop.permute.xlu2 %959 }
 0x21f   :  { %v771_v50 = vpop.permute.xlu1 %770  ;;  %v933_v51 = vpop.permute.xlu0 %932  ;;  %2188 = vmatpush.xpose.msk.msrb.mxu3 %vm555_vm8, %v960_v49 }
 0x220   :  { %2174 = vmatpush.xpose.msk.msrb.mxu0 %vm555_vm8, %v771_v50  ;;  %2186 = vmatpush.xpose.msk.msrb.mxu2 %vm555_vm8, %v933_v51 }
 0x223   :  { %2175 = vmatmul.msk.f32.vlgmr.msrb.gmra.mxu0 %vm555_vm8, %v2729_v20  ;;  %2187 = vmatmul.msk.f32.vlgmr.msrb.gmra.mxu2 %vm555_vm8, %v2727_v19 }
 0x224   :  { %2189 = vmatmul.msk.f32.vlgmr.msrb.gmra.mxu3 %vm555_vm8, %v2766_v33 }
 0x226   :  { %v879_v52 = vpop.permute.xlu2 %878 }
 0x227   :  { %v906_v53 = vpop.permute.xlu1 %905  ;;  %v798_v54 = vpop.permute.xlu0 %797  ;;  %2182 = vmatpush.xpose.msk.msra.mxu0 %vm555_vm8, %v879_v52 }
 0x228   :  { %2176 = vmatpush.xpose.msk.msrb.mxu1 %vm555_vm8, %v798_v54 }
 0x22b   :  { %2177 = vmatmul.msk.f32.vlgmr.msrb.gmra.mxu1 %vm555_vm8, %v2745_v18  ;;  %2183 = vmatmul.msk.f32.vlgmr.msra.gmra.mxu0 %vm555_vm8, %v2774_v37 }
 0x22c   :  { %2184 = vmatpush.xpose.msk.msra.mxu1 %vm555_vm8, %v906_v53 }
 0x22e   :  { %v2255_v55 = vpop.permute.xlu2 %2254 }
 0x22f   :  { %v2257_v56 = vunpack.i.h.bf16 %v2255_v55  ;;  %v2256_v57 = vunpack.i.l.bf16 %v2255_v55  ;;  %v2245_v58 = vpop.permute.xlu1 %2244  ;;  %v2250_v59 = vpop.permute.xlu0 %2249 }
 0x230   :  { %v2247_v60 = vunpack.i.h.bf16 %v2245_v58  ;;  %v2246_v61 = vunpack.i.l.bf16 %v2245_v58  ;;  %v2252_v62 = vunpack.i.h.bf16 %v2250_v59  ;;  %v2251_v63 = vunpack.i.l.bf16 %v2250_v59 }
 0x231   :  { %1209 = vmatpush.msrb.mxu1 %v2256_v57 }
 0x232   :  { %1183 = vmatpush.msrb.mxu0 %v2251_v63  ;;  %1235 = vmatpush.msra.mxu2 %v2246_v61 }
 0x233   :  { %1261 = vmatpush.msra.mxu3 %v2247_v60  ;;  %2185 = vmatmul.msk.f32.vlgmr.msra.gmra.mxu1 %vm555_vm8, %v2747_v26 }
 0x234   :  { %1339 = vmatpush.msrb.mxu2 %v2252_v62 }
 0x235   :  { %1365 = vmatpush.msrb.mxu3 %v2257_v56 }
 0x237   :  { %v2824_v0 = vpop.permute.xlu1 %2259 }
 0x238   :  { %v2261_v1 = vunpack.i.l.bf16 %v2824_v0 }
 0x23a   :  { %1287 = vmatpush.msra.mxu0 %v2261_v1 }
 0x275   :  { %v2830_v11 = vpop.f32.mrf.mxu2 }
 0x276   :  { %v992_v22 = vsel %vm985_vm9, %v2830_v11, -inf }
 0x27d   :  { %v658_v6 = vpop.f32.mrf.mxu3 }
 0x27e   :  { %v995_v7 = vsel %vm985_vm9, %v658_v6, -inf }
 0x27f   :  { %v577_v2 = vpop.f32.mrf.mxu0 }
 0x280   :  { %v986_v3 = vsel %vm985_vm9, %v577_v2, -inf }
 0x281   :  { %987 = vmax.xlane.f32.xlu1 %v986_v3 }
 0x287   :  { %v604_v4 = vpop.f32.mrf.mxu1 }
 0x288   :  { %v989_v5 = vsel %vm985_vm9, %v604_v4, -inf }
 0x289   :  { %990 = vmax.xlane.f32.xlu2 %v989_v5 }
 0x291   :  { %996 = vmax.xlane.f32.xlu2 %v995_v7 }
 0x295   :  { %v2837_v13 = vpop.f32.mrf.mxu2 }
 0x296   :  { %v2839_v17 = vpop.f32.mrf.mxu3  ;;  %v1004_v29 = vsel %vm985_vm9, %v2837_v13, -inf }
 0x297   :  { %v685_v12 = vpop.f32.mrf.mxu0  ;;  %v1007_v23 = vsel %vm985_vm9, %v2839_v17, -inf }
 0x298   :  { %v2832_v14 = vpop.f32.mrf.mxu1  ;;  %v998_v15 = vsel %vm985_vm9, %v685_v12, -inf }
 0x299   :  { %999 = vmax.xlane.f32.xlu0 %v998_v15  ;;  %v1001_v16 = vsel %vm985_vm9, %v2832_v14, -inf }
 0x29a   :  { %1002 = vmax.xlane.f32.xlu1 %v1001_v16 }
 0x29d   :  { %v2849_v25 = vpop.f32.mrf.mxu2 }
 0x29e   :  { %v2851_v27 = vpop.f32.mrf.mxu3  ;;  %v1016_v31 = vsel %vm985_vm9, %v2849_v25, -inf }
 0x29f   :  { %v1019_v40 = vsel %vm985_vm9, %v2851_v27, -inf }
 0x2a0   :  { %v2841_v21 = vpop.f32.mrf.mxu0 }
 0x2a1   :  { %993 = vmax.xlane.f32.xlu0 %v992_v22  ;;  %v1010_v24 = vsel %vm985_vm9, %v2841_v21, -inf }
 0x2a2   :  { %1008 = vmax.xlane.f32.xlu1 %v1007_v23  ;;  %1011 = vmax.xlane.f32.xlu2 %v1010_v24 }
 0x2a6   :  { %v2863_v34 = vpop.f32.mrf.mxu2 }
 0x2a7   :  { %v2865_v35 = vpop.f32.mrf.mxu3  ;;  %v1028_v39 = vsel %vm985_vm9, %v2863_v34, -inf }
 0x2a8   :  { %v2853_v28 = vpop.f32.mrf.mxu0  ;;  %v2861_v32 = vpop.f32.mrf.mxu1  ;;  %v1031_v38 = vsel %vm985_vm9, %v2865_v35, -inf }
 0x2a9   :  { %v1022_v30 = vsel %vm985_vm9, %v2853_v28, -inf  ;;  %1005 = vmax.xlane.f32.xlu0 %v1004_v29  ;;  %v1013_v36 = vsel %vm985_vm9, %v2861_v32, -inf }
 0x2aa   :  { %1023 = vmax.xlane.f32.xlu1 %v1022_v30  ;;  %1017 = vmax.xlane.f32.xlu2 %v1016_v31 }
 0x2b0   :  { %v2875_v41 = vpop.f32.mrf.mxu1 }
 0x2b1   :  { %1014 = vmax.xlane.f32.xlu0 %v1013_v36  ;;  %v1025_v42 = vsel %vm985_vm9, %v2875_v41, -inf }
 0x2b2   :  { %1032 = vmax.xlane.f32.xlu2 %v1031_v38  ;;  %1029 = vmax.xlane.f32.xlu1 %v1028_v39 }
 0x2b9   :  { %1020 = vmax.xlane.f32.xlu0 %v1019_v40 }
 0x2c1   :  { %1026 = vmax.xlane.f32.xlu0 %v1025_v42 }
 0x2f4   :  { %v988_v43 = vpop.xlane.xlu1 %987 }
 0x2f5   :  { %v1034_v44 = vsub.f32 %v577_v2, %v988_v43 }
 0x2f7   :  { %v1050_v45 = vmul.f32 1.442695, %v1034_v44 }
 0x2f9   :  { %2309 = vpow2.f32 %v1050_v45 }
 0x2fc   :  { %v991_v46 = vpop.xlane.xlu2 %990 }
 0x2fd   :  { %v1035_v47 = vsub.f32 %v604_v4, %v991_v46 }
 0x2ff   :  { %v2879_v48 = vpop.eup %2309  ;;  %v1052_v49 = vmul.f32 1.442695, %v1035_v47 }
 0x300   :  { %v1082_v50 = vsel %vm985_vm9, %v2879_v48, 0.0 }
 0x301   :  { %2311 = vpow2.f32 %v1052_v49  ;;  %1083 = vadd.xlane.f32.xlu0 %v1082_v50 }
 0x304   :  { %v997_v51 = vpop.xlane.xlu2 %996 }
 0x305   :  { %v1037_v52 = vsub.f32 %v658_v6, %v997_v51 }
 0x307   :  { %v2883_v53 = vpop.eup %2311  ;;  %v1056_v54 = vmul.f32 1.442695, %v1037_v52 }
 0x308   :  { %v1085_v55 = vsel %vm985_vm9, %v2883_v53, 0.0 }
 0x309   :  { %2313 = vpow2.f32 %v1056_v54  ;;  %1086 = vadd.xlane.f32.xlu0 %v1085_v55 }
 0x30c   :  { %v1000_v56 = vpop.xlane.xlu0 %999 }
 0x30d   :  { %v1038_v57 = vsub.f32 %v685_v12, %v1000_v56  ;;  %v1003_v61 = vpop.xlane.xlu1 %1002 }
 0x30e   :  { %v1039_v4 = vsub.f32 %v2832_v14, %v1003_v61  ;;  %v2268_v61 = vpack.i.bf16 %v2727_v19, %v2729_v20 }
 0x30f   :  { %v2887_v58 = vpop.eup %2313  ;;  %v1058_v59 = vmul.f32 1.442695, %v1038_v57 }
 0x310   :  { %v1091_v60 = vsel %vm985_vm9, %v2887_v58, 0.0  ;;  %v1060_v12 = vmul.f32 1.442695, %v1039_v4 }
 0x311   :  { %2315 = vpow2.f32 %v1058_v59  ;;  %1092 = vadd.xlane.f32.xlu1 %v1091_v60 }
 0x314   :  { %v994_v62 = vpop.xlane.xlu0 %993 }
 0x315   :  { %v1012_v63 = vpop.xlane.xlu2 %1011  ;;  %v1036_v1 = vsub.f32 %v2830_v11, %v994_v62  ;;  %v1009_v24 = vpop.xlane.xlu1 %1008 }
 0x316   :  { %v1042_v2 = vsub.f32 %v2841_v21, %v1012_v63  ;;  %v1041_v36 = vsub.f32 %v2839_v17, %v1009_v24 }
 0x317   :  { %v2893_v3 = vpop.eup %2315  ;;  %v1054_v5 = vmul.f32 1.442695, %v1036_v1 }
 0x318   :  { %v1066_v6 = vmul.f32 1.442695, %v1042_v2  ;;  %v1094_v7 = vsel %vm985_vm9, %v2893_v3, 0.0  ;;  %v1064_v39 = vmul.f32 1.442695, %v1041_v36  ;;  %v2263_v2 = vpack.i.bf16 %v2711_v9, %v2709_v8 }
 0x319   :  { %2317 = vpow2.f32 %v1054_v5  ;;  %1095 = vadd.xlane.f32.xlu0 %v1094_v7 }
 0x31a   :  { %2319 = vpow2.f32 %v1066_v6  ;;  %v2273_v6 = vpack.i.bf16 %v2766_v33, %v2745_v18 }
 0x31b   :  { %2321 = vpow2.f32 %v1060_v12 }
 0x31c   :  { %v1006_v15 = vpop.xlane.xlu0 %1005 }
 0x31d   :  { %v1040_v11 = vsub.f32 %v2837_v13, %v1006_v15  ;;  %v1018_v40 = vpop.xlane.xlu2 %1017  ;;  %v1024_v49 = vpop.xlane.xlu1 %1023 }
 0x31e   :  { %v1046_v52 = vsub.f32 %v2853_v28, %v1024_v49 }
 0x31f   :  { %v2898_v16 = vpop.eup %2317  ;;  %v1062_v23 = vmul.f32 1.442695, %v1040_v11 }
 0x320   :  { %v2901_v21 = vpop.eup %2319  ;;  %v1088_v14 = vsel %vm985_vm9, %v2898_v16, 0.0  ;;  %v1074_v55 = vmul.f32 1.442695, %v1046_v52 }
 0x321   :  { %v1106_v22 = vsel %vm985_vm9, %v2901_v21, 0.0  ;;  %1089 = vadd.xlane.f32.xlu2 %v1088_v14  ;;  %v2907_v30 = vpop.eup %2321  ;;  %2323 = vpow2.f32 %v1062_v23  ;;  %v2278_v14 = vpack.i.bf16 %v2747_v26, %v2774_v37 }
 0x322   :  { %1107 = vadd.xlane.f32.xlu0 %v1106_v22  ;;  %v1097_v38 = vsel %vm985_vm9, %v2907_v30, 0.0 }
 0x324   :  { %v1015_v29 = vpop.xlane.xlu0 %1014 }
 0x325   :  { %v1043_v31 = vsub.f32 %v2861_v32, %v1015_v29  ;;  %v1044_v32 = vsub.f32 %v2849_v25, %v1018_v40  ;;  %v1030_v56 = vpop.xlane.xlu1 %1029  ;;  %v1033_v19 = vpop.xlane.xlu2 %1032 }
 0x326   :  { %v1048_v59 = vsub.f32 %v2863_v34, %v1030_v56  ;;  %v1049_v20 = vsub.f32 %v2865_v35, %v1033_v19 }
 0x327   :  { %v1068_v13 = vmul.f32 1.442695, %v1043_v31  ;;  %v2913_v43 = vpop.eup %2323  ;;  %v1070_v50 = vmul.f32 1.442695, %v1044_v32 }
 0x328   :  { %v1100_v46 = vsel %vm985_vm9, %v2913_v43, 0.0  ;;  %v1078_v28 = vmul.f32 1.442695, %v1048_v59  ;;  %v1080_v4 = vmul.f32 1.442695, %v1049_v20 }
 0x329   :  { %2325 = vpow2.f32 %v1068_v13  ;;  %1098 = vadd.xlane.f32.xlu2 %v1097_v38 }
 0x32a   :  { %2327 = vpow2.f32 %v1064_v39  ;;  %v2262_v39 = vunpack.i.h.bf16 %v2824_v0 }
 0x32c   :  { %v1021_v42 = vpop.xlane.xlu0 %1020 }
 0x32d   :  { %v1045_v44 = vsub.f32 %v2851_v27, %v1021_v42 }
 0x32f   :  { %v2916_v45 = vpop.eup %2325  ;;  %v1072_v17 = vmul.f32 1.442695, %v1045_v44 }
 0x330   :  { %v1109_v47 = vsel %vm985_vm9, %v2916_v45, 0.0  ;;  %v2923_v51 = vpop.eup %2327 }
 0x331   :  { %2329 = vpow2.f32 %v1072_v17  ;;  %1101 = vadd.xlane.f32.xlu2 %v1100_v46  ;;  %1110 = vadd.xlane.f32.xlu0 %v1109_v47  ;;  %v1103_v25 = vsel %vm985_vm9, %v2923_v51, 0.0 }
 0x332   :  { %2331 = vpow2.f32 %v1070_v50 }
 0x333   :  { %2333 = vpow2.f32 %v1074_v55 }
 0x334   :  { %2335 = vpow2.f32 %v1078_v28  ;;  %v1027_v5 = vpop.xlane.xlu0 %1026 }
 0x335   :  { %2337 = vpow2.f32 %v1080_v4  ;;  %v1047_v7 = vsub.f32 %v2875_v41, %v1027_v5 }
 0x337   :  { %v2925_v27 = vpop.eup %2329  ;;  %v1076_v15 = vmul.f32 1.442695, %v1047_v7 }
 0x338   :  { %v1115_v54 = vsel %vm985_vm9, %v2925_v27, 0.0  ;;  %v2932_v57 = vpop.eup %2331 }
 0x339   :  { %1104 = vadd.xlane.f32.xlu2 %v1103_v25  ;;  %1116 = vadd.xlane.f32.xlu1 %v1115_v54  ;;  %v1112_v60 = vsel %vm985_vm9, %v2932_v57, 0.0  ;;  %v2939_v62 = vpop.eup %2333  ;;  %2339 = vpow2.f32 %v1076_v15 }
 0x33a   :  { %v1118_v63 = vsel %vm985_vm9, %v2939_v62, 0.0  ;;  %v2944_v1 = vpop.eup %2335 }
 0x33b   :  { %v1124_v34 = vsel %vm985_vm9, %v2944_v1, 0.0  ;;  %v2956_v12 = vpop.eup %2337 }
 0x33c   :  { %v1127_v8 = vsel %vm985_vm9, %v2956_v12, 0.0 }
 0x33f   :  { %v2960_v35 = vpop.eup %2339 }
 0x340   :  { %v1121_v18 = vsel %vm985_vm9, %v2960_v35, 0.0 }
 0x341   :  { %1113 = vadd.xlane.f32.xlu2 %v1112_v60 }
 0x345   :  { %2269 = vrot.lane.b32.xlu0 %v2268_v61, %s2381_s18 }
 0x349   :  { %1119 = vadd.xlane.f32.xlu2 %v1118_v63 }
 0x351   :  { %1125 = vadd.xlane.f32.xlu2 %v1124_v34 }
 0x352   :  { %2264 = vrot.lane.b32.xlu1 %v2263_v2, %s2381_s18 }
 0x369   :  { %2274 = vrot.lane.b32.xlu2 %v2273_v6, %s2381_s18 }
 0x36f   :  { %1128 = vadd.xlane.f32.xlu0 %v1127_v8 }
 0x374   :  { %v1084_v9 = vpop.xlane.xlu0 %1083 }
 0x375   :  { %2341 = vrcp.f32 %v1084_v9 }
 0x37b   :  { %v2342_v11 = vpop.eup %2341 }
 0x37c   :  { %v1146_v33 = vmul.f32 %v2342_v11, %v2879_v48  ;;  %1122 = vadd.xlane.f32.xlu1 %v1121_v18  ;;  %v1087_v41 = vpop.xlane.xlu0 %1086 }
 0x37d   :  { %2343 = vrcp.f32 %v1087_v41  ;;  %v1579_v41 = vld [vmem:[%s3151_s5 + $0x4] sm:$0xf] }
 0x37e   :  { %2190 = vmatmul.msk.f32.vlgmr.msrb.gmra.mxu0 %vm985_vm9, %v1146_v33  ;;  %v1578_v33 = vld [vmem:[%s3151_s5] sm:$0xf] }
 0x383   :  { %v2344_v22 = vpop.eup %2343  ;;  %2279 = vrot.lane.b32.xlu0 %v2278_v14, %s2381_s18  ;;  %v1582_v14 = vld [vmem:[%s3151_s5 + $0x10] sm:$0xf] }
 0x384   :  { %v1147_v23 = vmul.f32 %v2344_v22, %v2883_v53  ;;  %v1093_v24 = vpop.xlane.xlu1 %1092 }
 0x385   :  { %2345 = vrcp.f32 %v1093_v24  ;;  %v1584_v24 = vld [vmem:[%s3151_s5 + $0x18] sm:$0xf] }
 0x386   :  { %2191 = vmatmul.msk.f32.vlgmr.msrb.gmra.mxu1 %vm985_vm9, %v1147_v23 }
 0x38b   :  { %v2346_v29 = vpop.eup %2345 }
 0x38c   :  { %v1149_v48 = vmul.f32 %v2346_v29, %v2887_v58  ;;  %v1096_v31 = vpop.xlane.xlu0 %1095 }
 0x38d   :  { %2347 = vrcp.f32 %v1096_v31  ;;  %v1585_v31 = vld [vmem:[%s3151_s5 + $0x1c] sm:$0xf] }
 0x38e   :  { %2193 = vmatmul.msk.f32.vlgmr.msra.gmra.mxu3 %vm985_vm9, %v1149_v48  ;;  %v1586_v48 = vld [vmem:[%s3151_s5 + $0x20] sm:$0xf] }
 0x393   :  { %v2348_v36 = vpop.eup %2347 }
 0x394   :  { %v1150_v13 = vmul.f32 %v2348_v36, %v2893_v3  ;;  %v1090_v26 = vpop.xlane.xlu2 %1089 }
 0x395   :  { %2349 = vrcp.f32 %v1090_v26  ;;  %v1108_v40 = vpop.xlane.xlu0 %1107  ;;  %v1583_v26 = vld [vmem:[%s3151_s5 + $0x14] sm:$0xf] }
 0x396   :  { %2194 = vmatmul.msk.f32.vlgmr.msra.gmra.mxu0 %vm985_vm9, %v1150_v13  ;;  %v1588_v13 = vld [vmem:[%s3151_s5 + $0x28] sm:$0xf] }
 0x39b   :  { %v2350_v37 = vpop.eup %2349 }
 0x39c   :  { %v1148_v53 = vmul.f32 %v2350_v37, %v2898_v16  ;;  %v1099_v38 = vpop.xlane.xlu2 %1098  ;;  %v1589_v37 = vld [vmem:[%s3151_s5 + $0x2c] sm:$0xf] }
 0x39e   :  { %2192 = vmatmul.msk.f32.vlgmr.msra.gmra.mxu2 %vm985_vm9, %v1148_v53  ;;  %v1587_v53 = vld [vmem:[%s3151_s5 + $0x24] sm:$0xf] }
 0x39f   :  { %1443 = vmatpush.msra.mxu2 %v2262_v39  ;;  %v1592_v39 = vld [vmem:[%s3151_s5 + $0x38] sm:$0xf] }
 0x3a4   :  { %v1102_v58 = vpop.xlane.xlu2 %1101  ;;  %v1111_v32 = vpop.xlane.xlu0 %1110 }
 0x3a5   :  { %2351 = vrcp.f32 %v1102_v58 }
 0x3ab   :  { %v2352_v42 = vpop.eup %2351 }
 0x3ac   :  { %v1152_v44 = vmul.f32 %v2352_v42, %v2913_v43  ;;  %v1105_v3 = vpop.xlane.xlu2 %1104  ;;  %v1117_v43 = vpop.xlane.xlu1 %1116 }
 0x3ad   :  { %2353 = vrcp.f32 %v1105_v3 }
 0x3ae   :  { %2196 = vmatmul.msk.f32.vlgmr.msrb.gmra.mxu2 %vm985_vm9, %v1152_v44  ;;  %2355 = vrcp.f32 %v1108_v40 }
 0x3b3   :  { %v2354_v17 = vpop.eup %2353 }
 0x3b4   :  { %v1153_v16 = vmul.f32 %v2354_v17, %v2923_v51  ;;  %v1114_v46 = vpop.xlane.xlu2 %1113  ;;  %v2356_v0 = vpop.eup %2355  ;;  %v1593_v17 = vld [vmem:[%s3151_s5 + $0x3c] sm:$0xf] }
 0x3b5   :  { %2357 = vrcp.f32 %v1114_v46  ;;  %v1154_v52 = vmul.f32 %v2356_v0, %v2901_v21  ;;  %v1590_v46 = vld [vmem:[%s3151_s5 + $0x30] sm:$0xf]  ;;  %v1591_v0 = vld [vmem:[%s3151_s5 + $0x34] sm:$0xf] }
 0x3b6   :  { %2197 = vmatmul.msk.f32.vlgmr.msrb.gmra.mxu3 %vm985_vm9, %v1153_v16  ;;  %2359 = vrcp.f32 %v1099_v38 }
 0x3b7   :  { %v2270_v47 = vpop.permute.xlu0 %2269  ;;  %2361 = vrcp.f32 %v1117_v43 }
 0x3b8   :  { %v2272_v49 = vunpack.i.h.bf16 %v2270_v47  ;;  %v2271_v50 = vunpack.i.l.bf16 %v2270_v47  ;;  %2363 = vrcp.f32 %v1111_v32 }
 0x3ba   :  { %1391 = vmatpush.msrb.mxu0 %v2271_v50  ;;  %1547 = vmatpush.msrb.mxu2 %v2272_v49 }
 0x3bb   :  { %v2358_v25 = vpop.eup %2357  ;;  %2198 = vmatmul.msk.f32.vlgmr.msrb.gmra.mxu0 %vm985_vm9, %v1154_v52 }
 0x3bc   :  { %v1156_v54 = vmul.f32 %v2358_v25, %v2932_v57  ;;  %v1120_v51 = vpop.xlane.xlu2 %1119  ;;  %v2360_v55 = vpop.eup %2359 }
 0x3bd   :  { %v2362_v56 = vpop.eup %2361  ;;  %v1151_v61 = vmul.f32 %v2360_v55, %v2907_v30 }
 0x3be   :  { %2200 = vmatmul.msk.f32.vlgmr.msra.gmra.mxu2 %vm985_vm9, %v1156_v54  ;;  %v1157_v63 = vmul.f32 %v2362_v56, %v2925_v27  ;;  %v2364_v57 = vpop.eup %2363 }
 0x3bf   :  { %v1155_v5 = vmul.f32 %v2364_v57, %v2916_v45  ;;  %v1581_v45 = vld [vmem:[%s3151_s5 + $0xc] sm:$0xf] }
 0x3c4   :  { %v1126_v59 = vpop.xlane.xlu2 %1125  ;;  %v2265_v60 = vpop.permute.xlu1 %2264 }
 0x3c5   :  { %2365 = vrcp.f32 %v1126_v59  ;;  %v2267_v21 = vunpack.i.h.bf16 %v2265_v60  ;;  %v2266_v28 = vunpack.i.l.bf16 %v2265_v60 }
 0x3c7   :  { %1313 = vmatpush.msra.mxu1 %v2266_v28  ;;  %1469 = vmatpush.msra.mxu3 %v2267_v21 }
 0x3c8   :  { %2195 = vmatmul.msk.f32.vlgmr.msra.gmra.mxu1 %vm985_vm9, %v1151_v61  ;;  %2201 = vmatmul.msk.f32.vlgmr.msra.gmra.mxu3 %vm985_vm9, %v1157_v63 }
 0x3cb   :  { %v2366_v34 = vpop.eup %2365 }
 0x3cc   :  { %v1160_v2 = vmul.f32 %v2366_v34, %v2944_v1  ;;  %v2275_v19 = vpop.permute.xlu2 %2274 }
 0x3cd   :  { %v2277_v20 = vunpack.i.h.bf16 %v2275_v19  ;;  %v2276_v4 = vunpack.i.l.bf16 %v2275_v19 }
 0x3ce   :  { %2204 = vmatmul.msk.f32.vlgmr.msrb.gmra.mxu2 %vm985_vm9, %v1160_v2 }
 0x3cf   :  { %1417 = vmatpush.msrb.mxu1 %v2276_v4  ;;  %1573 = vmatpush.msrb.mxu3 %v2277_v20 }
 0x3d0   :  { %2199 = vmatmul.msk.f32.vlgmr.msrb.gmra.mxu1 %vm985_vm9, %v1155_v5 }
 0x3d1   :  { %2212 = vmatpush.msk.msra.mxu3 %vm1597_vm10, %v1581_v45 }
 0x3e2   :  { %v1129_v30 = vpop.xlane.xlu0 %1128 }
 0x3e3   :  { %2367 = vrcp.f32 %v1129_v30 }
 0x3e4   :  { %2369 = vrcp.f32 %v1120_v51 }
 0x3e9   :  { %v2368_v27 = vpop.eup %2367 }
 0x3ea   :  { %v1161_v6 = vmul.f32 %v2368_v27, %v2956_v12  ;;  %v2370_v7 = vpop.eup %2369  ;;  %v2301_v27 = vld [vmem:[%s3152_s6] ss:$0 sm:$0xff] }
 0x3eb   :  { %v1158_v18 = vmul.f32 %v2370_v7, %v2939_v62  ;;  %v3094_v7 = vld [vmem:[%s3146_s0] sm:$0xff] }
 0x3ec   :  { %2205 = vmatmul.msk.f32.vlgmr.msrb.gmra.mxu3 %vm985_vm9, %v1161_v6 }
 0x3ed   :  { %2220 = vmatpush.msk.msrb.mxu3 %vm1597_vm10, %v1585_v31 }
 0x3ef   :  { %v1123_v1 = vpop.xlane.xlu1 %1122 }
 0x3f0   :  { %2371 = vrcp.f32 %v1123_v1 }
 0x3f5   :  { %v2280_v15 = vpop.permute.xlu0 %2279 }
 0x3f6   :  { %v2372_v8 = vpop.eup %2371  ;;  %v2282_v9 = vunpack.i.h.bf16 %v2280_v15  ;;  %v2281_v11 = vunpack.i.l.bf16 %v2280_v15 }
 0x3f7   :  { %v1159_v12 = vmul.f32 %v2372_v8, %v2960_v35  ;;  %v1580_v35 = vld [vmem:[%s3151_s5 + $0x8] sm:$0xf] }
 0x3f8   :  { %1495 = vmatpush.msra.mxu0 %v2281_v11  ;;  %1521 = vmatpush.msra.mxu1 %v2282_v9 }
 0x3f9   :  { %2202 = vmatmul.msk.f32.vlgmr.msra.gmra.mxu0 %vm985_vm9, %v1158_v18  ;;  %2203 = vmatmul.msk.f32.vlgmr.msra.gmra.mxu1 %vm985_vm9, %v1159_v12 }
 0x3fa   :  { %2206 = vmatpush.msk.msrb.mxu0 %vm1597_vm10, %v1578_v33  ;;  %2208 = vmatpush.msk.msrb.mxu1 %vm1597_vm10, %v1579_v41 }
 0x3fb   :  { %v1185_v62 = vpop.f32.mrf.mxu0  ;;  %2210 = vmatpush.msk.msra.mxu2 %vm1597_vm10, %v1580_v35 }
 0x3fc   :  { %2214 = vmatpush.msk.msra.mxu0 %vm1597_vm10, %v1582_v14  ;;  %2216 = vmatpush.msk.msra.mxu1 %vm1597_vm10, %v1583_v26 }
 0x3fd   :  { %2218 = vmatpush.msk.msrb.mxu2 %vm1597_vm10, %v1584_v24 }
 0x401   :  { %2207 = vmatmul.msk.f32.vlgmr.msrb.gmra.mxu0 %vm555_vm8, %v1185_v62 }
 0x402   :  { %2222 = vmatpush.msk.msrb.mxu0 %vm1597_vm10, %v1586_v48 }
 0x403   :  { %v1211_v22 = vpop.f32.mrf.mxu1 }
 0x404   :  { %2209 = vmatmul.msk.f32.vlgmr.msrb.gmra.mxu1 %vm555_vm8, %v1211_v22 }
 0x405   :  { %2224 = vmatpush.msk.msrb.mxu1 %vm1597_vm10, %v1587_v53 }
 0x411   :  { %v1263_v23 = vpop.f32.mrf.mxu3 }
 0x412   :  { %2213 = vmatmul.msk.f32.vlgmr.msra.gmra.mxu3 %vm555_vm8, %v1263_v23 }
 0x413   :  { %v1289_v29 = vpop.f32.mrf.mxu0  ;;  %2228 = vmatpush.msk.msra.mxu3 %vm1597_vm10, %v1589_v37 }
 0x414   :  { %2215 = vmatmul.msk.f32.vlgmr.msra.gmra.mxu0 %vm555_vm8, %v1289_v29 }
 0x415   :  { %2230 = vmatpush.msk.msra.mxu0 %vm1597_vm10, %v1590_v46 }
 0x421   :  { %v1237_v36 = vpop.f32.mrf.mxu2 }
 0x422   :  { %2211 = vmatmul.msk.f32.vlgmr.msra.gmra.mxu2 %vm555_vm8, %v1237_v36 }
 0x423   :  { %2226 = vmatpush.msk.msra.mxu2 %vm1597_vm10, %v1588_v13 }
 0x431   :  { %v1341_v38 = vpop.f32.mrf.mxu2 }
 0x432   :  { %2219 = vmatmul.msk.f32.vlgmr.msrb.gmra.mxu2 %vm555_vm8, %v1341_v38 }
 0x433   :  { %2234 = vmatpush.msk.msrb.mxu2 %vm1597_vm10, %v1592_v39 }
 0x438   :  { %v1393_v58 = vpop.f32.mrf.mxu0 }
 0x439   :  { %v1367_v40 = vpop.f32.mrf.mxu3  ;;  %2223 = vmatmul.msk.f32.vlgmr.msrb.gmra.mxu0 %vm555_vm8, %v1393_v58 }
 0x43a   :  { %2221 = vmatmul.msk.f32.vlgmr.msrb.gmra.mxu3 %vm555_vm8, %v1367_v40 }
 0x43b   :  { %2236 = vmatpush.msk.msrb.mxu3 %vm1597_vm10, %v1593_v17 }
 0x441   :  { %v1445_v42 = vpop.f32.mrf.mxu2 }
 0x442   :  { %2227 = vmatmul.msk.f32.vlgmr.msra.gmra.mxu2 %vm555_vm8, %v1445_v42  ;;  %v3109_v42 = vld [vmem:[%s3146_s0 + $0x8] sm:$0xff] }
 0x445   :  { %v1315_v44 = vpop.f32.mrf.mxu1 }
 0x446   :  { %2217 = vmatmul.msk.f32.vlgmr.msra.gmra.mxu1 %vm555_vm8, %v1315_v44 }
 0x447   :  { %2232 = vmatpush.msk.msra.mxu1 %vm1597_vm10, %v1591_v0 }
 0x44b   :  { %v1471_v3 = vpop.f32.mrf.mxu3 }
 0x44c   :  { %2229 = vmatmul.msk.f32.vlgmr.msra.gmra.mxu3 %vm555_vm8, %v1471_v3 }
 0x44d   :  { %v1419_v32 = vpop.f32.mrf.mxu1 }
 0x44e   :  { %2225 = vmatmul.msk.f32.vlgmr.msrb.gmra.mxu1 %vm555_vm8, %v1419_v32 }
 0x451   :  { %v1549_v16 = vpop.f32.mrf.mxu2 }
 0x452   :  { %2235 = vmatmul.msk.f32.vlgmr.msrb.gmra.mxu2 %vm555_vm8, %v1549_v16 }
 0x46f   :  { %v1575_v47 = vpop.f32.mrf.mxu3 }
 0x470   :  { %2237 = vmatmul.msk.f32.vlgmr.msrb.gmra.mxu3 %vm555_vm8, %v1575_v47 }
 0x476   :  { %v1497_v49 = vpop.f32.mrf.mxu0  ;;  %v1523_v50 = vpop.f32.mrf.mxu1 }
 0x477   :  { %2231 = vmatmul.msk.f32.vlgmr.msra.gmra.mxu0 %vm555_vm8, %v1497_v49  ;;  %2233 = vmatmul.msk.f32.vlgmr.msra.gmra.mxu1 %vm555_vm8, %v1523_v50 }
 0x47e   :  { %v1618_v43 = vpop.f32.mrf.mxu0 }
 0x47f   :  { %v2011_v51 = vsel %vm34_vm0, %v1618_v43, 0.0 }
 0x481   :  { %v1644_v52 = vpop.f32.mrf.mxu1 }
 0x482   :  { %v2012_v54 = vsel %vm34_vm0, %v1644_v52, 0.0 }
 0x483   :  { %v2013_v56 = vadd.f32 %v2012_v54, %v2011_v51  ;;  %v2095_v54 = vld [vmem:[%s3154_s7 + $0x10] sm:$0xff]  ;;  %v2094_v51 = vld [vmem:[%s3154_s7 + $0x8] sm:$0xff] }
 0x491   :  { %v1722_v28 = vpop.f32.mrf.mxu0 }
 0x492   :  { %v2018_v63 = vsel %vm34_vm0, %v1722_v28, 0.0 }
 0x495   :  { %v1696_v59 = vpop.f32.mrf.mxu3 }
 0x496   :  { %v2016_v21 = vsel %vm34_vm0, %v1696_v59, 0.0 }
 0x4a5   :  { %v1670_v25 = vpop.f32.mrf.mxu2 }
 0x4a6   :  { %v2014_v55 = vsel %vm34_vm0, %v1670_v25, 0.0  ;;  %v2096_v25 = vld [vmem:[%s3154_s7 + $0x18] sm:$0xff] }
 0x4a7   :  { %v2015_v60 = vadd.f32 %v2014_v55, %v2013_v56  ;;  %2119 = vmatpush.msrb.mxu0 %v2096_v25  ;;  %v2093_v55 = vld [vmem:[%s3154_s7] sm:$0xff] }
 0x4a9   :  { %v2017_v61 = vadd.f32 %v2016_v21, %v2015_v60  ;;  %2120 = vmatpush.msrb.mxu0 %v2095_v54 }
 0x4ab   :  { %v2019_v2 = vadd.f32 %v2018_v63, %v2017_v61  ;;  %2121 = vmatpush.msrb.mxu0 %v2094_v51 }
 0x4ad   :  { %2122 = vmatpush.msrb.mxu0 %v2093_v55 }
 0x4b5   :  { %v1774_v57 = vpop.f32.mrf.mxu2 }
 0x4b6   :  { %v2022_v5 = vsel %vm34_vm0, %v1774_v57, 0.0  ;;  %v1826_v11 = vpop.f32.mrf.mxu0 }
 0x4b7   :  { %v2026_v12 = vsel %vm34_vm0, %v1826_v11, 0.0  ;;  %v2302_v11 = vld [vmem:[%s3153_s8] ss:$0 sm:$0xff] }
 0x4bd   :  { %v1800_v20 = vpop.f32.mrf.mxu3 }
 0x4be   :  { %v2024_v6 = vsel %vm34_vm0, %v1800_v20, 0.0 }
 0x4c3   :  { %v1748_v34 = vpop.f32.mrf.mxu1 }
 0x4c4   :  { %v2020_v19 = vsel %vm34_vm0, %v1748_v34, 0.0 }
 0x4c5   :  { %v2021_v4 = vadd.f32 %v2020_v19, %v2019_v2  ;;  %v1878_v33 = vpop.f32.mrf.mxu2 }
 0x4c6   :  { %v2029_v62 = vsel %vm34_vm0, %v1878_v33, 0.0 }
 0x4c7   :  { %v2023_v30 = vadd.f32 %v2022_v5, %v2021_v4 }
 0x4c9   :  { %v2025_v1 = vadd.f32 %v2024_v6, %v2023_v30 }
 0x4cb   :  { %v2045_v45 = vadd.f32 %v2301_v27, %v2025_v1  ;;  %v1852_v9 = vpop.f32.mrf.mxu1 }
 0x4cc   :  { %v2027_v18 = vsel %vm34_vm0, %v1852_v9, 0.0 }
 0x4cd   :  { %v2047_v15 = vadd.f32 %v3094_v7, %v2045_v45  ;;  %v2028_v41 = vadd.f32 %v2027_v18, %v2026_v12 }
 0x4cf   :  { %v2049_v8 = vsel %vm34_vm0, %v2047_v15, 0.0  ;;  %v1904_v14 = vpop.f32.mrf.mxu3  ;;  %v2030_v35 = vadd.f32 %v2029_v62, %v2028_v41 }
 0x4d0   :  { %2050 = vadd.xlane.f32.xlu0 %v2049_v8  ;;  %v2031_v22 = vsel %vm34_vm0, %v1904_v14, 0.0 }
 0x4d1   :  { %v2032_v23 = vadd.f32 %v2031_v22, %v2030_v35 }
 0x4d5   :  { %v1982_v31 = vpop.f32.mrf.mxu2 }
 0x4d6   :  { %v2037_v53 = vsel %vm34_vm0, %v1982_v31, 0.0 }
 0x4f3   :  { %v2008_v26 = vpop.f32.mrf.mxu3 }
 0x4f4   :  { %v1930_v24 = vpop.f32.mrf.mxu0  ;;  %v1956_v29 = vpop.f32.mrf.mxu1  ;;  %v2039_v39 = vsel %vm34_vm0, %v2008_v26, 0.0 }
 0x4f5   :  { %v2033_v48 = vsel %vm34_vm0, %v1930_v24, 0.0  ;;  %v2035_v13 = vsel %vm34_vm0, %v1956_v29, 0.0 }
 0x4f6   :  { %v2034_v36 = vadd.f32 %v2033_v48, %v2032_v23 }
 0x4f8   :  { %v2036_v37 = vadd.f32 %v2035_v13, %v2034_v36 }
 0x4fa   :  { %v2038_v38 = vadd.f32 %v2037_v53, %v2036_v37 }
 0x4fc   :  { %v2040_v58 = vadd.f32 %v2039_v39, %v2038_v38 }
 0x4fe   :  { %v2046_v40 = vadd.f32 %v2301_v27, %v2040_v58 }
 0x500   :  { %v2048_v44 = vadd.f32 %v3109_v42, %v2046_v40 }
 0x502   :  { %v2052_v3 = vsel %vm34_vm0, %v2048_v44, 0.0 }
 0x503   :  { %2053 = vadd.xlane.f32.xlu2 %v2052_v3 }
 0x543   :  { %v2051_v32 = vpop.xlane.xlu0 %2050 }
 0x544   :  { %v2055_v17 = vmul.f32 %v2051_v32, %v2440_v10 }
 0x546   :  { %v2057_v16 = vsub.f32 %v2047_v15, %v2055_v17 }
 0x548   :  { %v2059_v46 = vmul.f32 %v2057_v16, %v2057_v16 }
 0x54a   :  { %v2061_v0 = vsel %vm34_vm0, %v2059_v46, 0.0 }
 0x54b   :  { %2062 = vadd.xlane.f32.xlu1 %v2061_v0 }
 0x576   :  { %v2054_v47 = vpop.xlane.xlu2 %2053 }
 0x577   :  { %v2056_v49 = vmul.f32 %v2054_v47, %v2440_v10 }
 0x579   :  { %v2058_v50 = vsub.f32 %v2048_v44, %v2056_v49 }
 0x57b   :  { %v2060_v52 = vmul.f32 %v2058_v50, %v2058_v50 }
 0x57d   :  { %v2064_v43 = vsel %vm34_vm0, %v2060_v52, 0.0 }
 0x57e   :  { %2065 = vadd.xlane.f32.xlu1 %v2064_v43 }
 0x5be   :  { %v2063_v56 = vpop.xlane.xlu1 %2062 }
 0x5bf   :  { %v2067_v59 = vmul.f32 %v2063_v56, %v2440_v10 }
 0x5c1   :  { %v2069_v60 = vadd.f32 1e-05, %v2067_v59 }
 0x5c3   :  { %2373 = vrsqrt.f32 %v2069_v60  ;;  %vm2077_vm12 = vweird.f32 %v2069_v60 }
 0x5c9   :  { %v2374_v21 = vpop.eup %2373 }
 0x5ca   :  { %v2072_v28 = vmul.f32 %v2374_v21, %v2069_v60  ;;  %vm2078_vm11 = vweird.f32 %v2374_v21 }
 0x5cb   :  { %vm2079_vm13 = vmor %vm2077_vm12, %vm2078_vm11 }
 0x5cc   :  { %v2073_v61 = vmul.f32 %v2374_v21, %v2072_v28 }
 0x5ce   :  { %v2074_v63 = vmul.f32 0.5, %v2073_v61 }
 0x5d0   :  { %v2075_v57 = vsub.f32 1.5, %v2074_v63 }
 0x5d2   :  { %v2076_v34 = vmul.f32 %v2374_v21, %v2075_v57 }
 0x5d4   :  { %v2080_v2 = vsel %vm2079_vm13, %v2374_v21, %v2076_v34 }
 0x5d5   :  { %v2091_v19 = vmul.f32 %v2080_v2, %v2057_v16 }
 0x5d7   :  { %2238 = vmatmul.msk.f32.vlgmr.msrb.gmra.mxu0 %vm34_vm0, %v2091_v19 }
 0x5f1   :  { %v2066_v20 = vpop.xlane.xlu1 %2065 }
 0x5f2   :  { %v2068_v4 = vmul.f32 %v2066_v20, %v2440_v10 }
 0x5f4   :  { %v2070_v5 = vadd.f32 1e-05, %v2068_v4 }
 0x5f6   :  { %2375 = vrsqrt.f32 %v2070_v5  ;;  %vm2087_vm15 = vweird.f32 %v2070_v5 }
 0x5fc   :  { %v2376_v30 = vpop.eup %2375 }
 0x5fd   :  { %v2082_v27 = vmul.f32 %v2376_v30, %v2070_v5  ;;  %vm2088_vm14 = vweird.f32 %v2376_v30 }
 0x5fe   :  { %vm2089_vm1 = vmor %vm2087_vm15, %vm2088_vm14 }
 0x5ff   :  { %v2083_v6 = vmul.f32 %v2376_v30, %v2082_v27 }
 0x601   :  { %v2084_v1 = vmul.f32 0.5, %v2083_v6 }
 0x603   :  { %v2085_v45 = vsub.f32 1.5, %v2084_v1 }
 0x605   :  { %v2086_v15 = vmul.f32 %v2376_v30, %v2085_v45 }
 0x607   :  { %v2090_v8 = vsel %vm2089_vm1, %v2376_v30, %v2086_v15 }
 0x608   :  { %v2092_v9 = vmul.f32 %v2090_v8, %v2058_v50 }
 0x60a   :  { %2239 = vmatmul.msk.f32.gmra.mxu0 %vm34_vm0, %v2092_v9 }
 0x654   :  { %v2124_v10 = vpop.f32.mrf.mxu0 }
 0x655   :  { %v2125_v18 = vadd.f32 %v2302_v11, %v2124_v10 }
 0x657   :  { %v2130_v12 = vmax.f32 %v2125_v18, 0.0 }
 0x659   :  { %v2132_v33 = vadd.f32 %v3094_v7, %v2130_v12 }
 0x65b   :  { %v2134_v41 = vsel %vm34_vm0, %v2132_v33, 0.0 }
 0x65c   :  { %2136 = vst [vmem:[%s3155_s9] sm:$0xff] %v2134_v41 }
 0x687   :  { %v2127_v14 = vpop.f32.mrf.mxu0 }
 0x688   :  { %v2128_v62 = vadd.f32 %v2302_v11, %v2127_v14 }
 0x68a   :  { %v2131_v35 = vmax.f32 %v2128_v62, 0.0 }
 0x68c   :  { %v2133_v22 = vadd.f32 %v3109_v42, %v2131_v35 }
 0x68e   :  { %v2135_v23 = vsel %vm34_vm0, %v2133_v22, 0.0 }
 0x68f   :  { %2137 = vst [vmem:[%s3155_s9 + $0x8] sm:$0xff] %v2135_v23 }

</bundles_post_ra>
